<compile_context>
chip_gen: v7x
topology: tpu7x:2x2x1
jax: 0.10.0
libtpu: 0.0.40
codegen_flags: <defaults>
</compile_context>

<pallas_src>
import functools
import math

import jax
import jax.numpy as jnp
from jax import lax
from jax.experimental import pallas as pl
from jax.experimental.pallas import tpu as pltpu

# ---------------- config (small, synthetic) ----------------
VOCAB = 50
DIM = 32
N_LAYERS = 2
N_HEADS = 2
DIM_FF = 64
MAX_LEN = 16
N_SEGMENTS = 2
EPS = 1e-12
NEG_INF = -1e9

HEAD_DIM = DIM // N_HEADS
EMB_ROWS = VOCAB + MAX_LEN + N_SEGMENTS        # fused [token | position | segment] table
N_VEC = 2 + 6 * N_LAYERS + 4                   # rows in the packed (1, DIM) vector buffer


# ---------------- in-kernel helpers (trace-time inlined, f32) ----------------
def _layernorm(x, g, b):
    mu = jnp.mean(x, axis=-1, keepdims=True)
    xc = x - mu
    var = jnp.mean(xc * xc, axis=-1, keepdims=True)
    return g * (xc * lax.rsqrt(var + EPS)) + b


def _gelu(x):
    # TODO(synk): reference model uses erf-GELU; tanh approximation (~1e-3 diff).
    return 0.5 * x * (1.0 + jnp.tanh(0.7978845608028654 * (x + 0.044715 * x * x * x)))


# ---------------- the single fused kernel ----------------
def _generator_kernel(
    ids_ref,        # (3, B*S, 1) int32 : [token id, VOCAB+pos_id, VOCAB+MAX_LEN+seg_id]
    mask_ref,       # (B, 1, S)   f32   : attention mask (1 = keep)
    mpos_ref,       # (B*P, 1)    int32 : flattened global masked positions (b*S + pos)
    emb_ref,        # (EMB_ROWS, D) bf16: [tok_embed ; pos_embed ; seg_embed]
    wqkv_ref,       # (L, 3, H, D, dh) bf16 : per-head q/k/v projection weights
    bqkv_ref,       # (L, 3, H, 1, dh) f32
    wo_ref,         # (L, H, dh, D) bf16    : per-head output projection
    wff_ref,        # (L, 2, D, F) bf16     : [wff1, wff2^T]
    bff1_ref,       # (L, 1, F) f32
    vec_ref,        # (N_VEC, 1, D) f32     : packed LN gains / D-width biases
    whead_ref,      # (3, D, D) bf16        : [fc_w, lin_w, cls_w (lane-padded)]
    obias_ref,      # (2, 1, VOCAB) f32     : [decoder bias ; cls bias in first 2 lanes]
    lm_ref,         # (B*P, VOCAB) f32  out
    clsf_ref,       # (B, 2) f32        out
    *, B, S, P, n_layers, n_heads):
    f32, bf16 = jnp.float32, jnp.bfloat16
    BS = B * S
    D = whead_ref.shape[-1]
    dh = D // n_heads
    scale = 1.0 / math.sqrt(dh)
    head_base = 2 + 6 * n_layers            # first head-param row in vec_ref

    # ---- embeddings: fused token+position+segment lookup as ONE one-hot matmul ----
    col = lax.broadcasted_iota(jnp.int32, (BS, EMB_ROWS), 1)
    hot = (col == ids_ref[0]) | (col == ids_ref[1]) | (col == ids_ref[2])
    onehot = jnp.where(hot, 1.0, 0.0).astype(bf16)                        # (BS, E)
    e = jnp.dot(onehot, emb_ref[...], preferred_element_type=f32)         # (BS, D)
    h = _layernorm(e, vec_ref[0], vec_ref[1])                             # (BS, D) f32

    # additive attention-mask bias, broadcast over query positions
    bias = (1.0 - mask_ref[...]) * NEG_INF                                # (B, 1, S)

    # ---- encoder layers (statically unrolled, VMEM-resident activations) ----
    for l in range(n_layers):
        x = h                                                             # (BS, D) f32
        xb = x.astype(bf16)
        attn = None
        for hh in range(n_heads):                                         # H = 2
            q = (jnp.dot(xb, wqkv_ref[l, 0, hh], preferred_element_type=f32)
                 + bqkv_ref[l, 0, hh]).reshape(B, S, dh)
            k = (jnp.dot(xb, wqkv_ref[l, 1, hh], preferred_element_type=f32)
                 + bqkv_ref[l, 1, hh]).reshape(B, S, dh)
            v = (jnp.dot(xb, wqkv_ref[l, 2, hh], preferred_element_type=f32)
                 + bqkv_ref[l, 2, hh]).reshape(B, S, dh)
            s = jnp.einsum('bqd,bkd->bqk', q.astype(bf16), k.astype(bf16),
                           preferred_element_type=f32) * scale + bias      # (B,S,S)
            s = s - jnp.max(s, axis=-1, keepdims=True)
            p = jnp.exp(s)
            p = p * pl.reciprocal(jnp.sum(p, axis=-1, keepdims=True), approx=True)
            ctx = jnp.einsum('bqk,bkd->bqd', p.astype(bf16), v.astype(bf16),
                             preferred_element_type=f32)                   # (B,S,dh)
            contrib = jnp.dot(ctx.reshape(BS, dh).astype(bf16), wo_ref[l, hh],
                              preferred_element_type=f32)                  # (BS, D)
            attn = contrib if attn is None else attn + contrib
        attn = attn + vec_ref[2 + 6 * l + 0]                              # bo
        h1 = _layernorm(x + attn, vec_ref[2 + 6 * l + 1], vec_ref[2 + 6 * l + 2])
        ff = _gelu(jnp.dot(h1.astype(bf16), wff_ref[l, 0],
                           preferred_element_type=f32) + bff1_ref[l])      # (BS, F)
        ff = lax.dot_general(ff.astype(bf16), wff_ref[l, 1],               # wff2^T
                             (((1,), (1,)), ((), ())),
                             preferred_element_type=f32) + vec_ref[2 + 6 * l + 3]
        h = _layernorm(h1 + ff, vec_ref[2 + 6 * l + 4], vec_ref[2 + 6 * l + 5])

    # ---- pooled [CLS] -> tanh(fc) -> classifier (one-hot selection matmul) ----
    r_iota = lax.broadcasted_iota(jnp.int32, (B, BS), 0)
    c_iota = lax.broadcasted_iota(jnp.int32, (B, BS), 1)
    cls_sel = jnp.where(c_iota == r_iota * S, 1.0, 0.0)                   # (B, BS) exact
    cls_h = jnp.dot(cls_sel, h, preferred_element_type=f32)               # (B, D)
    pooled = jnp.tanh(jnp.dot(cls_h.astype(bf16), whead_ref[0],
                              preferred_element_type=f32) + vec_ref[head_base + 0])
    cls_logits = jnp.dot(pooled.astype(bf16), whead_ref[2],               # cls_w padded
                         preferred_element_type=f32)                      # (B, D)
    clsf_ref[...] = cls_logits[:, :2] + obias_ref[1][:, :2]

    # ---- masked-LM head: one-hot row gather as a single MXU matmul ----
    mcol = lax.broadcasted_iota(jnp.int32, (B * P, BS), 1)
    msel = jnp.where(mcol == mpos_ref[...], 1.0, 0.0)                     # (B*P, BS)
    h_m = jnp.dot(msel, h, preferred_element_type=f32)                    # (B*P, D)
    # module defines activ2 = ReLU (forward's `self.active2` is a typo in the reference)
    h_m = jnp.maximum(jnp.dot(h_m.astype(bf16), whead_ref[1],
                              preferred_element_type=f32) + vec_ref[head_base + 1], 0.0)
    h_m = _layernorm(h_m, vec_ref[head_base + 2], vec_ref[head_base + 3])
    # tied decoder: contract feature dim of tok_embed in place (trans_b dot)
    lm = lax.dot_general(h_m.astype(bf16), emb_ref[0:VOCAB, :],
                         (((1,), (1,)), ((), ())), preferred_element_type=f32)
    lm_ref[...] = lm + obias_ref[0]


# ---------------- parameters (deterministic, synthetic; kernel-ready packed layout) ----------------
def init_params(key):
    def normal(k, shape, std=0.02):
        return std * jax.random.normal(k, shape, jnp.float32)

    keys = iter(jax.random.split(key, 32))
    bf16 = jnp.bfloat16

    tok_embed = normal(next(keys), (VOCAB, DIM))
    pos_embed = normal(next(keys), (MAX_LEN, DIM))
    seg_embed = normal(next(keys), (N_SEGMENTS, DIM))
    emb_table = jnp.concatenate([tok_embed, pos_embed, seg_embed], axis=0)  # (E, D)

    def per_head(w):  # (D, D) -> (H, D, dh): split output features across heads
        return jnp.transpose(w.reshape(DIM, N_HEADS, HEAD_DIM), (1, 0, 2))

    w_qkv, w_o, w_ff = [], [], []
    for _ in range(N_LAYERS):
        wq = normal(next(keys), (DIM, DIM))
        wk = normal(next(keys), (DIM, DIM))
        wv = normal(next(keys), (DIM, DIM))
        w_qkv.append(jnp.stack([per_head(wq), per_head(wk), per_head(wv)]))  # (3,H,D,dh)
        w_o.append(normal(next(keys), (DIM, DIM)).reshape(N_HEADS, HEAD_DIM, DIM))
        wff1 = normal(next(keys), (DIM, DIM_FF))
        wff2 = normal(next(keys), (DIM_FF, DIM))
        w_ff.append(jnp.stack([wff1, wff2.T]))                               # (2, D, F)

    fc_w = normal(next(keys), (DIM, DIM))
    lin_w = normal(next(keys), (DIM, DIM))
    cls_w = normal(next(keys), (DIM, 2))
    w_head = jnp.stack([fc_w, lin_w, jnp.pad(cls_w, ((0, 0), (0, DIM - 2)))])  # (3,D,D)

    ones_r = jnp.ones((1, DIM), jnp.float32)
    zeros_r = jnp.zeros((1, DIM), jnp.float32)
    rows = [ones_r, zeros_r]                                    # emb LN gamma, beta
    for _ in range(N_LAYERS):
        rows += [zeros_r, ones_r, zeros_r, zeros_r, ones_r, zeros_r]  # bo,g1,be1,bff2,g2,be2
    rows += [zeros_r, zeros_r, ones_r, zeros_r]                 # fc_b, lin_b, norm_g, norm_b
    vec_d = jnp.stack(rows)                                     # (N_VEC, 1, D)
    assert vec_d.shape[0] == N_VEC

    return {
        "emb_table": emb_table.astype(bf16),                    # (E, D)
        "w_qkv": jnp.stack(w_qkv).astype(bf16),                 # (L, 3, H, D, dh)
        "b_qkv": jnp.zeros((N_LAYERS, 3, N_HEADS, 1, HEAD_DIM), jnp.float32),
        "w_o": jnp.stack(w_o).astype(bf16),                     # (L, H, dh, D)
        "w_ff": jnp.stack(w_ff).astype(bf16),                   # (L, 2, D, F)
        "b_ff1": jnp.zeros((N_LAYERS, 1, DIM_FF), jnp.float32),
        "vec_d": vec_d,                                         # (N_VEC, 1, D)
        "w_head": w_head.astype(bf16),                          # (3, D, D)
        "out_bias": jnp.zeros((2, 1, VOCAB), jnp.float32),      # [decoder bias ; cls bias]
    }


# ---------------- forward: one pallas_call for the whole model ----------------
def generator_forward(p, input_idx, segment_idx, input_mask, masked_pos):
    B, S = input_idx.shape
    P = masked_pos.shape[1]
    BS = B * S
    assert S <= MAX_LEN

    # integer-index plumbing (host side): offsets select rows of the fused table
    tok = input_idx.reshape(BS).astype(jnp.int32)
    pos = jnp.tile(jnp.arange(S, dtype=jnp.int32), B) + VOCAB
    seg = segment_idx.reshape(BS).astype(jnp.int32) + VOCAB + MAX_LEN
    ids = jnp.stack([tok, pos, seg]).reshape(3, BS, 1)
    mask3 = input_mask.astype(jnp.float32).reshape(B, 1, S)
    mpos = (masked_pos.astype(jnp.int32)
            + S * jnp.arange(B, dtype=jnp.int32)[:, None]).reshape(B * P, 1)

    kernel = functools.partial(_generator_kernel, B=B, S=S, P=P,
                               n_layers=N_LAYERS, n_heads=N_HEADS)
    vmem = pl.BlockSpec(memory_space=pltpu.MemorySpace.VMEM)

    logits_lm, logits_clsf = pl.pallas_call(
        kernel,
        in_specs=[vmem] * 12,
        out_specs=(vmem, vmem),
        out_shape=(jax.ShapeDtypeStruct((B * P, VOCAB), jnp.float32),
                   jax.ShapeDtypeStruct((B, 2), jnp.float32)),
    )(
        ids, mask3, mpos,
        p["emb_table"], p["w_qkv"], p["b_qkv"], p["w_o"], p["w_ff"], p["b_ff1"],
        p["vec_d"], p["w_head"], p["out_bias"],
    )
    return logits_lm.reshape(B, P, VOCAB), logits_clsf


if __name__ == "__main__":
    key = jax.random.PRNGKey(0)
    kp, k1, k2, k3 = jax.random.split(key, 4)
    params = init_params(kp)

    B, S, P = 2, 8, 3
    input_idx = jax.random.randint(k1, (B, S), 0, VOCAB, dtype=jnp.int32)
    segment_idx = jnp.concatenate(
        [jnp.zeros((B, S // 2), jnp.int32), jnp.ones((B, S // 2), jnp.int32)], axis=1)
    input_mask = jnp.ones((B, S), jnp.int32).at[1, -2:].set(0)
    masked_pos = jax.random.randint(k3, (B, P), 0, S, dtype=jnp.int32)

    fwd = jax.jit(generator_forward)
    logits_lm, logits_clsf = fwd(params, input_idx, segment_idx, input_mask, masked_pos)
    jax.block_until_ready((logits_lm, logits_clsf))

    assert logits_lm.shape == (B, P, VOCAB), logits_lm.shape
    assert logits_clsf.shape == (B, 2), logits_clsf.shape
    assert jnp.all(jnp.isfinite(logits_lm)) and jnp.all(jnp.isfinite(logits_clsf))
    print("KERNEL_OK")
</pallas_src>

<mosaic_0001>
module attributes {stable_mosaic.version = 11 : i64} {
  func.func @_generator_kernel(%arg0: memref<3x16x1xi32, #tpu.memory_space<vmem>>, %arg1: memref<2x1x8xf32, #tpu.memory_space<vmem>>, %arg2: memref<6x1xi32, #tpu.memory_space<vmem>>, %arg3: memref<68x32xbf16, #tpu.memory_space<vmem>>, %arg4: memref<2x3x2x32x16xbf16, #tpu.memory_space<vmem>>, %arg5: memref<2x3x2x1x16xf32, #tpu.memory_space<vmem>>, %arg6: memref<2x2x16x32xbf16, #tpu.memory_space<vmem>>, %arg7: memref<2x2x32x64xbf16, #tpu.memory_space<vmem>>, %arg8: memref<2x1x64xf32, #tpu.memory_space<vmem>>, %arg9: memref<18x1x32xf32, #tpu.memory_space<vmem>>, %arg10: memref<3x32x32xbf16, #tpu.memory_space<vmem>>, %arg11: memref<2x1x50xf32, #tpu.memory_space<vmem>>, %arg12: memref<6x50xf32, #tpu.memory_space<vmem>>, %arg13: memref<2x2xf32, #tpu.memory_space<vmem>>) attributes {dimension_semantics = [], scalar_prefetch = 0 : i64, scratch_operands = 0 : i64, tpu.core_type = #tpu.core_type<tc>} {
    %0 = tpu.iota {dimensions = array<i32: 1>} : vector<16x68xi32>
    %c0 = arith.constant 0 : index
    %c0_0 = arith.constant 0 : index
    %c0_1 = arith.constant 0 : index
    %1 = vector.load %arg0[%c0, %c0_0, %c0_1] : memref<3x16x1xi32, #tpu.memory_space<vmem>>, vector<1x16x1xi32>
    %2 = vector.shape_cast %1 : vector<1x16x1xi32> to vector<16x1xi32>
    %3 = vector.broadcast %2 : vector<16x1xi32> to vector<16x68xi32>
    %4 = arith.cmpi eq, %0, %3 : vector<16x68xi32>
    %c1 = arith.constant 1 : index
    %c0_2 = arith.constant 0 : index
    %c0_3 = arith.constant 0 : index
    %5 = vector.load %arg0[%c1, %c0_2, %c0_3] : memref<3x16x1xi32, #tpu.memory_space<vmem>>, vector<1x16x1xi32>
    %6 = vector.shape_cast %5 : vector<1x16x1xi32> to vector<16x1xi32>
    %7 = vector.broadcast %6 : vector<16x1xi32> to vector<16x68xi32>
    %8 = arith.cmpi eq, %0, %7 : vector<16x68xi32>
    %9 = arith.ori %4, %8 : vector<16x68xi1>
    %c2 = arith.constant 2 : index
    %c0_4 = arith.constant 0 : index
    %c0_5 = arith.constant 0 : index
    %10 = vector.load %arg0[%c2, %c0_4, %c0_5] : memref<3x16x1xi32, #tpu.memory_space<vmem>>, vector<1x16x1xi32>
    %11 = vector.shape_cast %10 : vector<1x16x1xi32> to vector<16x1xi32>
    %12 = vector.broadcast %11 : vector<16x1xi32> to vector<16x68xi32>
    %13 = arith.cmpi eq, %0, %12 : vector<16x68xi32>
    %14 = arith.ori %9, %13 : vector<16x68xi1>
    %cst = arith.constant 1.000000e+00 : f32
    %cst_6 = arith.constant 0.000000e+00 : f32
    %15 = vector.broadcast %cst : f32 to vector<16x68xf32>
    %16 = vector.broadcast %cst_6 : f32 to vector<16x68xf32>
    %17 = arith.select %14, %15, %16 : vector<16x68xi1>, vector<16x68xf32>
    %18 = arith.truncf %17 : vector<16x68xf32> to vector<16x68xbf16>
    %c0_7 = arith.constant 0 : index
    %c0_8 = arith.constant 0 : index
    %19 = vector.load %arg3[%c0_7, %c0_8] : memref<68x32xbf16, #tpu.memory_space<vmem>>, vector<68x32xbf16>
    %cst_9 = arith.constant dense<0.000000e+00> : vector<16x32xf32>
    %20 = tpu.matmul %18, %19, %cst_9 {dimension_numbers = #tpu.dot_dimension_numbers<[1], [0], [0], [1], [0, 0, 1, 1], [], []>} : vector<16x68xbf16>, vector<68x32xbf16>, vector<16x32xf32> -> vector<16x32xf32>
    %c0_10 = arith.constant 0 : index
    %c0_11 = arith.constant 0 : index
    %c0_12 = arith.constant 0 : index
    %21 = vector.load %arg9[%c0_10, %c0_11, %c0_12] : memref<18x1x32xf32, #tpu.memory_space<vmem>>, vector<1x1x32xf32>
    %22 = vector.shape_cast %21 : vector<1x1x32xf32> to vector<1x32xf32>
    %c1_13 = arith.constant 1 : index
    %c0_14 = arith.constant 0 : index
    %c0_15 = arith.constant 0 : index
    %23 = vector.load %arg9[%c1_13, %c0_14, %c0_15] : memref<18x1x32xf32, #tpu.memory_space<vmem>>, vector<1x1x32xf32>
    %24 = vector.shape_cast %23 : vector<1x1x32xf32> to vector<1x32xf32>
    %cst_16 = arith.constant dense<0.000000e+00> : vector<16xf32>
    %25 = vector.multi_reduction <add>, %20, %cst_16 [1] : vector<16x32xf32> to vector<16xf32>
    %26 = vector.shape_cast %25 : vector<16xf32> to vector<16x1xf32>
    %cst_17 = arith.constant 3.200000e+01 : f32
    %27 = vector.broadcast %cst_17 : f32 to vector<16x1xf32>
    %28 = arith.divf %26, %27 : vector<16x1xf32>
    %29 = vector.broadcast %28 : vector<16x1xf32> to vector<16x32xf32>
    %30 = arith.subf %20, %29 : vector<16x32xf32>
    %31 = arith.mulf %30, %30 : vector<16x32xf32>
    %cst_18 = arith.constant dense<0.000000e+00> : vector<16xf32>
    %32 = vector.multi_reduction <add>, %31, %cst_18 [1] : vector<16x32xf32> to vector<16xf32>
    %33 = vector.shape_cast %32 : vector<16xf32> to vector<16x1xf32>
    %cst_19 = arith.constant 3.200000e+01 : f32
    %34 = vector.broadcast %cst_19 : f32 to vector<16x1xf32>
    %35 = arith.divf %33, %34 : vector<16x1xf32>
    %cst_20 = arith.constant 9.99999996E-13 : f32
    %36 = vector.broadcast %cst_20 : f32 to vector<16x1xf32>
    %37 = arith.addf %35, %36 : vector<16x1xf32>
    %38 = math.rsqrt %37 : vector<16x1xf32>
    %39 = vector.broadcast %38 : vector<16x1xf32> to vector<16x32xf32>
    %40 = arith.mulf %30, %39 : vector<16x32xf32>
    %41 = vector.broadcast %22 : vector<1x32xf32> to vector<16x32xf32>
    %42 = arith.mulf %41, %40 : vector<16x32xf32>
    %43 = vector.broadcast %24 : vector<1x32xf32> to vector<16x32xf32>
    %44 = arith.addf %42, %43 : vector<16x32xf32>
    %c0_21 = arith.constant 0 : index
    %c0_22 = arith.constant 0 : index
    %c0_23 = arith.constant 0 : index
    %45 = vector.load %arg1[%c0_21, %c0_22, %c0_23] : memref<2x1x8xf32, #tpu.memory_space<vmem>>, vector<2x1x8xf32>
    %cst_24 = arith.constant 1.000000e+00 : f32
    %46 = vector.broadcast %cst_24 : f32 to vector<2x1x8xf32>
    %47 = arith.subf %46, %45 : vector<2x1x8xf32>
    %cst_25 = arith.constant -1.000000e+09 : f32
    %48 = vector.broadcast %cst_25 : f32 to vector<2x1x8xf32>
    %49 = arith.mulf %47, %48 : vector<2x1x8xf32>
    %50 = arith.truncf %44 : vector<16x32xf32> to vector<16x32xbf16>
    %c0_26 = arith.constant 0 : index
    %c0_27 = arith.constant 0 : index
    %c0_28 = arith.constant 0 : index
    %c0_29 = arith.constant 0 : index
    %c0_30 = arith.constant 0 : index
    %51 = vector.load %arg4[%c0_26, %c0_27, %c0_28, %c0_29, %c0_30] : memref<2x3x2x32x16xbf16, #tpu.memory_space<vmem>>, vector<1x1x1x32x16xbf16>
    %52 = vector.shape_cast %51 : vector<1x1x1x32x16xbf16> to vector<32x16xbf16>
    %cst_31 = arith.constant dense<0.000000e+00> : vector<16x16xf32>
    %53 = tpu.matmul %50, %52, %cst_31 {dimension_numbers = #tpu.dot_dimension_numbers<[1], [0], [0], [1], [0, 0, 1, 1], [], []>} : vector<16x32xbf16>, vector<32x16xbf16>, vector<16x16xf32> -> vector<16x16xf32>
    %c0_32 = arith.constant 0 : index
    %c0_33 = arith.constant 0 : index
    %c0_34 = arith.constant 0 : index
    %c0_35 = arith.constant 0 : index
    %c0_36 = arith.constant 0 : index
    %54 = vector.load %arg5[%c0_32, %c0_33, %c0_34, %c0_35, %c0_36] : memref<2x3x2x1x16xf32, #tpu.memory_space<vmem>>, vector<1x1x1x1x16xf32>
    %55 = vector.shape_cast %54 : vector<1x1x1x1x16xf32> to vector<1x16xf32>
    %56 = vector.broadcast %55 : vector<1x16xf32> to vector<16x16xf32>
    %57 = arith.addf %53, %56 : vector<16x16xf32>
    %58 = vector.shape_cast %57 : vector<16x16xf32> to vector<2x8x16xf32>
    %c0_37 = arith.constant 0 : index
    %c1_38 = arith.constant 1 : index
    %c0_39 = arith.constant 0 : index
    %c0_40 = arith.constant 0 : index
    %c0_41 = arith.constant 0 : index
    %59 = vector.load %arg4[%c0_37, %c1_38, %c0_39, %c0_40, %c0_41] : memref<2x3x2x32x16xbf16, #tpu.memory_space<vmem>>, vector<1x1x1x32x16xbf16>
    %60 = vector.shape_cast %59 : vector<1x1x1x32x16xbf16> to vector<32x16xbf16>
    %cst_42 = arith.constant dense<0.000000e+00> : vector<16x16xf32>
    %61 = tpu.matmul %50, %60, %cst_42 {dimension_numbers = #tpu.dot_dimension_numbers<[1], [0], [0], [1], [0, 0, 1, 1], [], []>} : vector<16x32xbf16>, vector<32x16xbf16>, vector<16x16xf32> -> vector<16x16xf32>
    %c0_43 = arith.constant 0 : index
    %c1_44 = arith.constant 1 : index
    %c0_45 = arith.constant 0 : index
    %c0_46 = arith.constant 0 : index
    %c0_47 = arith.constant 0 : index
    %62 = vector.load %arg5[%c0_43, %c1_44, %c0_45, %c0_46, %c0_47] : memref<2x3x2x1x16xf32, #tpu.memory_space<vmem>>, vector<1x1x1x1x16xf32>
    %63 = vector.shape_cast %62 : vector<1x1x1x1x16xf32> to vector<1x16xf32>
    %64 = vector.broadcast %63 : vector<1x16xf32> to vector<16x16xf32>
    %65 = arith.addf %61, %64 : vector<16x16xf32>
    %66 = vector.shape_cast %65 : vector<16x16xf32> to vector<2x8x16xf32>
    %c0_48 = arith.constant 0 : index
    %c2_49 = arith.constant 2 : index
    %c0_50 = arith.constant 0 : index
    %c0_51 = arith.constant 0 : index
    %c0_52 = arith.constant 0 : index
    %67 = vector.load %arg4[%c0_48, %c2_49, %c0_50, %c0_51, %c0_52] : memref<2x3x2x32x16xbf16, #tpu.memory_space<vmem>>, vector<1x1x1x32x16xbf16>
    %68 = vector.shape_cast %67 : vector<1x1x1x32x16xbf16> to vector<32x16xbf16>
    %cst_53 = arith.constant dense<0.000000e+00> : vector<16x16xf32>
    %69 = tpu.matmul %50, %68, %cst_53 {dimension_numbers = #tpu.dot_dimension_numbers<[1], [0], [0], [1], [0, 0, 1, 1], [], []>} : vector<16x32xbf16>, vector<32x16xbf16>, vector<16x16xf32> -> vector<16x16xf32>
    %c0_54 = arith.constant 0 : index
    %c2_55 = arith.constant 2 : index
    %c0_56 = arith.constant 0 : index
    %c0_57 = arith.constant 0 : index
    %c0_58 = arith.constant 0 : index
    %70 = vector.load %arg5[%c0_54, %c2_55, %c0_56, %c0_57, %c0_58] : memref<2x3x2x1x16xf32, #tpu.memory_space<vmem>>, vector<1x1x1x1x16xf32>
    %71 = vector.shape_cast %70 : vector<1x1x1x1x16xf32> to vector<1x16xf32>
    %72 = vector.broadcast %71 : vector<1x16xf32> to vector<16x16xf32>
    %73 = arith.addf %69, %72 : vector<16x16xf32>
    %74 = vector.shape_cast %73 : vector<16x16xf32> to vector<2x8x16xf32>
    %75 = arith.truncf %58 : vector<2x8x16xf32> to vector<2x8x16xbf16>
    %76 = arith.truncf %66 : vector<2x8x16xf32> to vector<2x8x16xbf16>
    "tpu.trace_start"() <{level = 10 : i32, message = "bqd,bkd->bqk"}> : () -> ()
    %cst_59 = arith.constant dense<0.000000e+00> : vector<2x8x8xf32>
    %77 = tpu.matmul %75, %76, %cst_59 {dimension_numbers = #tpu.dot_dimension_numbers<[2], [2], [1], [1], [0, 0, 0, 1, 1, 1], [0], [0]>} : vector<2x8x16xbf16>, vector<2x8x16xbf16>, vector<2x8x8xf32> -> vector<2x8x8xf32>
    "tpu.trace_stop"() : () -> ()
    %cst_60 = arith.constant 2.500000e-01 : f32
    %78 = vector.broadcast %cst_60 : f32 to vector<2x8x8xf32>
    %79 = arith.mulf %77, %78 : vector<2x8x8xf32>
    %80 = vector.broadcast %49 : vector<2x1x8xf32> to vector<2x8x8xf32>
    %81 = arith.addf %79, %80 : vector<2x8x8xf32>
    %cst_61 = arith.constant dense<0xFF800000> : vector<2x8xf32>
    %82 = vector.multi_reduction <maximumf>, %81, %cst_61 [2] : vector<2x8x8xf32> to vector<2x8xf32>
    %83 = vector.shape_cast %82 : vector<2x8xf32> to vector<2x8x1xf32>
    %84 = vector.broadcast %83 : vector<2x8x1xf32> to vector<2x8x8xf32>
    %85 = arith.subf %81, %84 : vector<2x8x8xf32>
    %86 = math.exp %85 : vector<2x8x8xf32>
    %cst_62 = arith.constant dense<0.000000e+00> : vector<2x8xf32>
    %87 = vector.multi_reduction <add>, %86, %cst_62 [2] : vector<2x8x8xf32> to vector<2x8xf32>
    %88 = vector.shape_cast %87 : vector<2x8xf32> to vector<2x8x1xf32>
    %89 = tpu.reciprocal %88 {approx = true} : vector<2x8x1xf32> -> vector<2x8x1xf32>
    %90 = vector.broadcast %89 : vector<2x8x1xf32> to vector<2x8x8xf32>
    %91 = arith.mulf %86, %90 : vector<2x8x8xf32>
    %92 = arith.truncf %91 : vector<2x8x8xf32> to vector<2x8x8xbf16>
    %93 = arith.truncf %74 : vector<2x8x16xf32> to vector<2x8x16xbf16>
    "tpu.trace_start"() <{level = 10 : i32, message = "bqk,bkd->bqd"}> : () -> ()
    %cst_63 = arith.constant dense<0.000000e+00> : vector<2x8x16xf32>
    %94 = tpu.matmul %92, %93, %cst_63 {dimension_numbers = #tpu.dot_dimension_numbers<[2], [1], [1], [2], [0, 0, 0, 1, 1, 2], [0], [0]>} : vector<2x8x8xbf16>, vector<2x8x16xbf16>, vector<2x8x16xf32> -> vector<2x8x16xf32>
    "tpu.trace_stop"() : () -> ()
    %95 = vector.shape_cast %94 : vector<2x8x16xf32> to vector<16x16xf32>
    %96 = arith.truncf %95 : vector<16x16xf32> to vector<16x16xbf16>
    %c0_64 = arith.constant 0 : index
    %c0_65 = arith.constant 0 : index
    %c0_66 = arith.constant 0 : index
    %c0_67 = arith.constant 0 : index
    %97 = vector.load %arg6[%c0_64, %c0_65, %c0_66, %c0_67] : memref<2x2x16x32xbf16, #tpu.memory_space<vmem>>, vector<1x1x16x32xbf16>
    %98 = vector.shape_cast %97 : vector<1x1x16x32xbf16> to vector<16x32xbf16>
    %cst_68 = arith.constant dense<0.000000e+00> : vector<16x32xf32>
    %99 = tpu.matmul %96, %98, %cst_68 {dimension_numbers = #tpu.dot_dimension_numbers<[1], [0], [0], [1], [0, 0, 1, 1], [], []>} : vector<16x16xbf16>, vector<16x32xbf16>, vector<16x32xf32> -> vector<16x32xf32>
    %c0_69 = arith.constant 0 : index
    %c0_70 = arith.constant 0 : index
    %c1_71 = arith.constant 1 : index
    %c0_72 = arith.constant 0 : index
    %c0_73 = arith.constant 0 : index
    %100 = vector.load %arg4[%c0_69, %c0_70, %c1_71, %c0_72, %c0_73] : memref<2x3x2x32x16xbf16, #tpu.memory_space<vmem>>, vector<1x1x1x32x16xbf16>
    %101 = vector.shape_cast %100 : vector<1x1x1x32x16xbf16> to vector<32x16xbf16>
    %cst_74 = arith.constant dense<0.000000e+00> : vector<16x16xf32>
    %102 = tpu.matmul %50, %101, %cst_74 {dimension_numbers = #tpu.dot_dimension_numbers<[1], [0], [0], [1], [0, 0, 1, 1], [], []>} : vector<16x32xbf16>, vector<32x16xbf16>, vector<16x16xf32> -> vector<16x16xf32>
    %c0_75 = arith.constant 0 : index
    %c0_76 = arith.constant 0 : index
    %c1_77 = arith.constant 1 : index
    %c0_78 = arith.constant 0 : index
    %c0_79 = arith.constant 0 : index
    %103 = vector.load %arg5[%c0_75, %c0_76, %c1_77, %c0_78, %c0_79] : memref<2x3x2x1x16xf32, #tpu.memory_space<vmem>>, vector<1x1x1x1x16xf32>
    %104 = vector.shape_cast %103 : vector<1x1x1x1x16xf32> to vector<1x16xf32>
    %105 = vector.broadcast %104 : vector<1x16xf32> to vector<16x16xf32>
    %106 = arith.addf %102, %105 : vector<16x16xf32>
    %107 = vector.shape_cast %106 : vector<16x16xf32> to vector<2x8x16xf32>
    %c0_80 = arith.constant 0 : index
    %c1_81 = arith.constant 1 : index
    %c1_82 = arith.constant 1 : index
    %c0_83 = arith.constant 0 : index
    %c0_84 = arith.constant 0 : index
    %108 = vector.load %arg4[%c0_80, %c1_81, %c1_82, %c0_83, %c0_84] : memref<2x3x2x32x16xbf16, #tpu.memory_space<vmem>>, vector<1x1x1x32x16xbf16>
    %109 = vector.shape_cast %108 : vector<1x1x1x32x16xbf16> to vector<32x16xbf16>
    %cst_85 = arith.constant dense<0.000000e+00> : vector<16x16xf32>
    %110 = tpu.matmul %50, %109, %cst_85 {dimension_numbers = #tpu.dot_dimension_numbers<[1], [0], [0], [1], [0, 0, 1, 1], [], []>} : vector<16x32xbf16>, vector<32x16xbf16>, vector<16x16xf32> -> vector<16x16xf32>
    %c0_86 = arith.constant 0 : index
    %c1_87 = arith.constant 1 : index
    %c1_88 = arith.constant 1 : index
    %c0_89 = arith.constant 0 : index
    %c0_90 = arith.constant 0 : index
    %111 = vector.load %arg5[%c0_86, %c1_87, %c1_88, %c0_89, %c0_90] : memref<2x3x2x1x16xf32, #tpu.memory_space<vmem>>, vector<1x1x1x1x16xf32>
    %112 = vector.shape_cast %111 : vector<1x1x1x1x16xf32> to vector<1x16xf32>
    %113 = vector.broadcast %112 : vector<1x16xf32> to vector<16x16xf32>
    %114 = arith.addf %110, %113 : vector<16x16xf32>
    %115 = vector.shape_cast %114 : vector<16x16xf32> to vector<2x8x16xf32>
    %c0_91 = arith.constant 0 : index
    %c2_92 = arith.constant 2 : index
    %c1_93 = arith.constant 1 : index
    %c0_94 = arith.constant 0 : index
    %c0_95 = arith.constant 0 : index
    %116 = vector.load %arg4[%c0_91, %c2_92, %c1_93, %c0_94, %c0_95] : memref<2x3x2x32x16xbf16, #tpu.memory_space<vmem>>, vector<1x1x1x32x16xbf16>
    %117 = vector.shape_cast %116 : vector<1x1x1x32x16xbf16> to vector<32x16xbf16>
    %cst_96 = arith.constant dense<0.000000e+00> : vector<16x16xf32>
    %118 = tpu.matmul %50, %117, %cst_96 {dimension_numbers = #tpu.dot_dimension_numbers<[1], [0], [0], [1], [0, 0, 1, 1], [], []>} : vector<16x32xbf16>, vector<32x16xbf16>, vector<16x16xf32> -> vector<16x16xf32>
    %c0_97 = arith.constant 0 : index
    %c2_98 = arith.constant 2 : index
    %c1_99 = arith.constant 1 : index
    %c0_100 = arith.constant 0 : index
    %c0_101 = arith.constant 0 : index
    %119 = vector.load %arg5[%c0_97, %c2_98, %c1_99, %c0_100, %c0_101] : memref<2x3x2x1x16xf32, #tpu.memory_space<vmem>>, vector<1x1x1x1x16xf32>
    %120 = vector.shape_cast %119 : vector<1x1x1x1x16xf32> to vector<1x16xf32>
    %121 = vector.broadcast %120 : vector<1x16xf32> to vector<16x16xf32>
    %122 = arith.addf %118, %121 : vector<16x16xf32>
    %123 = vector.shape_cast %122 : vector<16x16xf32> to vector<2x8x16xf32>
    %124 = arith.truncf %107 : vector<2x8x16xf32> to vector<2x8x16xbf16>
    %125 = arith.truncf %115 : vector<2x8x16xf32> to vector<2x8x16xbf16>
    "tpu.trace_start"() <{level = 10 : i32, message = "bqd,bkd->bqk"}> : () -> ()
    %cst_102 = arith.constant dense<0.000000e+00> : vector<2x8x8xf32>
    %126 = tpu.matmul %124, %125, %cst_102 {dimension_numbers = #tpu.dot_dimension_numbers<[2], [2], [1], [1], [0, 0, 0, 1, 1, 1], [0], [0]>} : vector<2x8x16xbf16>, vector<2x8x16xbf16>, vector<2x8x8xf32> -> vector<2x8x8xf32>
    "tpu.trace_stop"() : () -> ()
    %cst_103 = arith.constant 2.500000e-01 : f32
    %127 = vector.broadcast %cst_103 : f32 to vector<2x8x8xf32>
    %128 = arith.mulf %126, %127 : vector<2x8x8xf32>
    %129 = vector.broadcast %49 : vector<2x1x8xf32> to vector<2x8x8xf32>
    %130 = arith.addf %128, %129 : vector<2x8x8xf32>
    %cst_104 = arith.constant dense<0xFF800000> : vector<2x8xf32>
    %131 = vector.multi_reduction <maximumf>, %130, %cst_104 [2] : vector<2x8x8xf32> to vector<2x8xf32>
    %132 = vector.shape_cast %131 : vector<2x8xf32> to vector<2x8x1xf32>
    %133 = vector.broadcast %132 : vector<2x8x1xf32> to vector<2x8x8xf32>
    %134 = arith.subf %130, %133 : vector<2x8x8xf32>
    %135 = math.exp %134 : vector<2x8x8xf32>
    %cst_105 = arith.constant dense<0.000000e+00> : vector<2x8xf32>
    %136 = vector.multi_reduction <add>, %135, %cst_105 [2] : vector<2x8x8xf32> to vector<2x8xf32>
    %137 = vector.shape_cast %136 : vector<2x8xf32> to vector<2x8x1xf32>
    %138 = tpu.reciprocal %137 {approx = true} : vector<2x8x1xf32> -> vector<2x8x1xf32>
    %139 = vector.broadcast %138 : vector<2x8x1xf32> to vector<2x8x8xf32>
    %140 = arith.mulf %135, %139 : vector<2x8x8xf32>
    %141 = arith.truncf %140 : vector<2x8x8xf32> to vector<2x8x8xbf16>
    %142 = arith.truncf %123 : vector<2x8x16xf32> to vector<2x8x16xbf16>
    "tpu.trace_start"() <{level = 10 : i32, message = "bqk,bkd->bqd"}> : () -> ()
    %cst_106 = arith.constant dense<0.000000e+00> : vector<2x8x16xf32>
    %143 = tpu.matmul %141, %142, %cst_106 {dimension_numbers = #tpu.dot_dimension_numbers<[2], [1], [1], [2], [0, 0, 0, 1, 1, 2], [0], [0]>} : vector<2x8x8xbf16>, vector<2x8x16xbf16>, vector<2x8x16xf32> -> vector<2x8x16xf32>
    "tpu.trace_stop"() : () -> ()
    %144 = vector.shape_cast %143 : vector<2x8x16xf32> to vector<16x16xf32>
    %145 = arith.truncf %144 : vector<16x16xf32> to vector<16x16xbf16>
    %c0_107 = arith.constant 0 : index
    %c1_108 = arith.constant 1 : index
    %c0_109 = arith.constant 0 : index
    %c0_110 = arith.constant 0 : index
    %146 = vector.load %arg6[%c0_107, %c1_108, %c0_109, %c0_110] : memref<2x2x16x32xbf16, #tpu.memory_space<vmem>>, vector<1x1x16x32xbf16>
    %147 = vector.shape_cast %146 : vector<1x1x16x32xbf16> to vector<16x32xbf16>
    %cst_111 = arith.constant dense<0.000000e+00> : vector<16x32xf32>
    %148 = tpu.matmul %145, %147, %cst_111 {dimension_numbers = #tpu.dot_dimension_numbers<[1], [0], [0], [1], [0, 0, 1, 1], [], []>} : vector<16x16xbf16>, vector<16x32xbf16>, vector<16x32xf32> -> vector<16x32xf32>
    %149 = arith.addf %99, %148 : vector<16x32xf32>
    %c2_112 = arith.constant 2 : index
    %c0_113 = arith.constant 0 : index
    %c0_114 = arith.constant 0 : index
    %150 = vector.load %arg9[%c2_112, %c0_113, %c0_114] : memref<18x1x32xf32, #tpu.memory_space<vmem>>, vector<1x1x32xf32>
    %151 = vector.shape_cast %150 : vector<1x1x32xf32> to vector<1x32xf32>
    %152 = vector.broadcast %151 : vector<1x32xf32> to vector<16x32xf32>
    %153 = arith.addf %149, %152 : vector<16x32xf32>
    %154 = arith.addf %44, %153 : vector<16x32xf32>
    %c3 = arith.constant 3 : index
    %c0_115 = arith.constant 0 : index
    %c0_116 = arith.constant 0 : index
    %155 = vector.load %arg9[%c3, %c0_115, %c0_116] : memref<18x1x32xf32, #tpu.memory_space<vmem>>, vector<1x1x32xf32>
    %156 = vector.shape_cast %155 : vector<1x1x32xf32> to vector<1x32xf32>
    %c4 = arith.constant 4 : index
    %c0_117 = arith.constant 0 : index
    %c0_118 = arith.constant 0 : index
    %157 = vector.load %arg9[%c4, %c0_117, %c0_118] : memref<18x1x32xf32, #tpu.memory_space<vmem>>, vector<1x1x32xf32>
    %158 = vector.shape_cast %157 : vector<1x1x32xf32> to vector<1x32xf32>
    %cst_119 = arith.constant dense<0.000000e+00> : vector<16xf32>
    %159 = vector.multi_reduction <add>, %154, %cst_119 [1] : vector<16x32xf32> to vector<16xf32>
    %160 = vector.shape_cast %159 : vector<16xf32> to vector<16x1xf32>
    %cst_120 = arith.constant 3.200000e+01 : f32
    %161 = vector.broadcast %cst_120 : f32 to vector<16x1xf32>
    %162 = arith.divf %160, %161 : vector<16x1xf32>
    %163 = vector.broadcast %162 : vector<16x1xf32> to vector<16x32xf32>
    %164 = arith.subf %154, %163 : vector<16x32xf32>
    %165 = arith.mulf %164, %164 : vector<16x32xf32>
    %cst_121 = arith.constant dense<0.000000e+00> : vector<16xf32>
    %166 = vector.multi_reduction <add>, %165, %cst_121 [1] : vector<16x32xf32> to vector<16xf32>
    %167 = vector.shape_cast %166 : vector<16xf32> to vector<16x1xf32>
    %cst_122 = arith.constant 3.200000e+01 : f32
    %168 = vector.broadcast %cst_122 : f32 to vector<16x1xf32>
    %169 = arith.divf %167, %168 : vector<16x1xf32>
    %cst_123 = arith.constant 9.99999996E-13 : f32
    %170 = vector.broadcast %cst_123 : f32 to vector<16x1xf32>
    %171 = arith.addf %169, %170 : vector<16x1xf32>
    %172 = math.rsqrt %171 : vector<16x1xf32>
    %173 = vector.broadcast %172 : vector<16x1xf32> to vector<16x32xf32>
    %174 = arith.mulf %164, %173 : vector<16x32xf32>
    %175 = vector.broadcast %156 : vector<1x32xf32> to vector<16x32xf32>
    %176 = arith.mulf %175, %174 : vector<16x32xf32>
    %177 = vector.broadcast %158 : vector<1x32xf32> to vector<16x32xf32>
    %178 = arith.addf %176, %177 : vector<16x32xf32>
    %179 = arith.truncf %178 : vector<16x32xf32> to vector<16x32xbf16>
    %c0_124 = arith.constant 0 : index
    %c0_125 = arith.constant 0 : index
    %c0_126 = arith.constant 0 : index
    %c0_127 = arith.constant 0 : index
    %180 = vector.load %arg7[%c0_124, %c0_125, %c0_126, %c0_127] : memref<2x2x32x64xbf16, #tpu.memory_space<vmem>>, vector<1x1x32x64xbf16>
    %181 = vector.shape_cast %180 : vector<1x1x32x64xbf16> to vector<32x64xbf16>
    %cst_128 = arith.constant dense<0.000000e+00> : vector<16x64xf32>
    %182 = tpu.matmul %179, %181, %cst_128 {dimension_numbers = #tpu.dot_dimension_numbers<[1], [0], [0], [1], [0, 0, 1, 1], [], []>} : vector<16x32xbf16>, vector<32x64xbf16>, vector<16x64xf32> -> vector<16x64xf32>
    %c0_129 = arith.constant 0 : index
    %c0_130 = arith.constant 0 : index
    %c0_131 = arith.constant 0 : index
    %183 = vector.load %arg8[%c0_129, %c0_130, %c0_131] : memref<2x1x64xf32, #tpu.memory_space<vmem>>, vector<1x1x64xf32>
    %184 = vector.shape_cast %183 : vector<1x1x64xf32> to vector<1x64xf32>
    %185 = vector.broadcast %184 : vector<1x64xf32> to vector<16x64xf32>
    %186 = arith.addf %182, %185 : vector<16x64xf32>
    %cst_132 = arith.constant 5.000000e-01 : f32
    %187 = vector.broadcast %cst_132 : f32 to vector<16x64xf32>
    %188 = arith.mulf %187, %186 : vector<16x64xf32>
    %cst_133 = arith.constant 4.471500e-02 : f32
    %189 = vector.broadcast %cst_133 : f32 to vector<16x64xf32>
    %190 = arith.mulf %189, %186 : vector<16x64xf32>
    %191 = arith.mulf %190, %186 : vector<16x64xf32>
    %192 = arith.mulf %191, %186 : vector<16x64xf32>
    %193 = arith.addf %186, %192 : vector<16x64xf32>
    %cst_134 = arith.constant 0.797884583 : f32
    %194 = vector.broadcast %cst_134 : f32 to vector<16x64xf32>
    %195 = arith.mulf %194, %193 : vector<16x64xf32>
    %196 = math.tanh %195 : vector<16x64xf32>
    %cst_135 = arith.constant 1.000000e+00 : f32
    %197 = vector.broadcast %cst_135 : f32 to vector<16x64xf32>
    %198 = arith.addf %197, %196 : vector<16x64xf32>
    %199 = arith.mulf %188, %198 : vector<16x64xf32>
    %200 = arith.truncf %199 : vector<16x64xf32> to vector<16x64xbf16>
    %c0_136 = arith.constant 0 : index
    %c1_137 = arith.constant 1 : index
    %c0_138 = arith.constant 0 : index
    %c0_139 = arith.constant 0 : index
    %201 = vector.load %arg7[%c0_136, %c1_137, %c0_138, %c0_139] : memref<2x2x32x64xbf16, #tpu.memory_space<vmem>>, vector<1x1x32x64xbf16>
    %202 = vector.shape_cast %201 : vector<1x1x32x64xbf16> to vector<32x64xbf16>
    %cst_140 = arith.constant dense<0.000000e+00> : vector<16x32xf32>
    %203 = tpu.matmul %200, %202, %cst_140 {dimension_numbers = #tpu.dot_dimension_numbers<[1], [1], [0], [0], [0, 0, 1, 0], [], []>} : vector<16x64xbf16>, vector<32x64xbf16>, vector<16x32xf32> -> vector<16x32xf32>
    %c5 = arith.constant 5 : index
    %c0_141 = arith.constant 0 : index
    %c0_142 = arith.constant 0 : index
    %204 = vector.load %arg9[%c5, %c0_141, %c0_142] : memref<18x1x32xf32, #tpu.memory_space<vmem>>, vector<1x1x32xf32>
    %205 = vector.shape_cast %204 : vector<1x1x32xf32> to vector<1x32xf32>
    %206 = vector.broadcast %205 : vector<1x32xf32> to vector<16x32xf32>
    %207 = arith.addf %203, %206 : vector<16x32xf32>
    %208 = arith.addf %178, %207 : vector<16x32xf32>
    %c6 = arith.constant 6 : index
    %c0_143 = arith.constant 0 : index
    %c0_144 = arith.constant 0 : index
    %209 = vector.load %arg9[%c6, %c0_143, %c0_144] : memref<18x1x32xf32, #tpu.memory_space<vmem>>, vector<1x1x32xf32>
    %210 = vector.shape_cast %209 : vector<1x1x32xf32> to vector<1x32xf32>
    %c7 = arith.constant 7 : index
    %c0_145 = arith.constant 0 : index
    %c0_146 = arith.constant 0 : index
    %211 = vector.load %arg9[%c7, %c0_145, %c0_146] : memref<18x1x32xf32, #tpu.memory_space<vmem>>, vector<1x1x32xf32>
    %212 = vector.shape_cast %211 : vector<1x1x32xf32> to vector<1x32xf32>
    %cst_147 = arith.constant dense<0.000000e+00> : vector<16xf32>
    %213 = vector.multi_reduction <add>, %208, %cst_147 [1] : vector<16x32xf32> to vector<16xf32>
    %214 = vector.shape_cast %213 : vector<16xf32> to vector<16x1xf32>
    %cst_148 = arith.constant 3.200000e+01 : f32
    %215 = vector.broadcast %cst_148 : f32 to vector<16x1xf32>
    %216 = arith.divf %214, %215 : vector<16x1xf32>
    %217 = vector.broadcast %216 : vector<16x1xf32> to vector<16x32xf32>
    %218 = arith.subf %208, %217 : vector<16x32xf32>
    %219 = arith.mulf %218, %218 : vector<16x32xf32>
    %cst_149 = arith.constant dense<0.000000e+00> : vector<16xf32>
    %220 = vector.multi_reduction <add>, %219, %cst_149 [1] : vector<16x32xf32> to vector<16xf32>
    %221 = vector.shape_cast %220 : vector<16xf32> to vector<16x1xf32>
    %cst_150 = arith.constant 3.200000e+01 : f32
    %222 = vector.broadcast %cst_150 : f32 to vector<16x1xf32>
    %223 = arith.divf %221, %222 : vector<16x1xf32>
    %cst_151 = arith.constant 9.99999996E-13 : f32
    %224 = vector.broadcast %cst_151 : f32 to vector<16x1xf32>
    %225 = arith.addf %223, %224 : vector<16x1xf32>
    %226 = math.rsqrt %225 : vector<16x1xf32>
    %227 = vector.broadcast %226 : vector<16x1xf32> to vector<16x32xf32>
    %228 = arith.mulf %218, %227 : vector<16x32xf32>
    %229 = vector.broadcast %210 : vector<1x32xf32> to vector<16x32xf32>
    %230 = arith.mulf %229, %228 : vector<16x32xf32>
    %231 = vector.broadcast %212 : vector<1x32xf32> to vector<16x32xf32>
    %232 = arith.addf %230, %231 : vector<16x32xf32>
    %233 = arith.truncf %232 : vector<16x32xf32> to vector<16x32xbf16>
    %c1_152 = arith.constant 1 : index
    %c0_153 = arith.constant 0 : index
    %c0_154 = arith.constant 0 : index
    %c0_155 = arith.constant 0 : index
    %c0_156 = arith.constant 0 : index
    %234 = vector.load %arg4[%c1_152, %c0_153, %c0_154, %c0_155, %c0_156] : memref<2x3x2x32x16xbf16, #tpu.memory_space<vmem>>, vector<1x1x1x32x16xbf16>
    %235 = vector.shape_cast %234 : vector<1x1x1x32x16xbf16> to vector<32x16xbf16>
    %cst_157 = arith.constant dense<0.000000e+00> : vector<16x16xf32>
    %236 = tpu.matmul %233, %235, %cst_157 {dimension_numbers = #tpu.dot_dimension_numbers<[1], [0], [0], [1], [0, 0, 1, 1], [], []>} : vector<16x32xbf16>, vector<32x16xbf16>, vector<16x16xf32> -> vector<16x16xf32>
    %c1_158 = arith.constant 1 : index
    %c0_159 = arith.constant 0 : index
    %c0_160 = arith.constant 0 : index
    %c0_161 = arith.constant 0 : index
    %c0_162 = arith.constant 0 : index
    %237 = vector.load %arg5[%c1_158, %c0_159, %c0_160, %c0_161, %c0_162] : memref<2x3x2x1x16xf32, #tpu.memory_space<vmem>>, vector<1x1x1x1x16xf32>
    %238 = vector.shape_cast %237 : vector<1x1x1x1x16xf32> to vector<1x16xf32>
    %239 = vector.broadcast %238 : vector<1x16xf32> to vector<16x16xf32>
    %240 = arith.addf %236, %239 : vector<16x16xf32>
    %241 = vector.shape_cast %240 : vector<16x16xf32> to vector<2x8x16xf32>
    %c1_163 = arith.constant 1 : index
    %c1_164 = arith.constant 1 : index
    %c0_165 = arith.constant 0 : index
    %c0_166 = arith.constant 0 : index
    %c0_167 = arith.constant 0 : index
    %242 = vector.load %arg4[%c1_163, %c1_164, %c0_165, %c0_166, %c0_167] : memref<2x3x2x32x16xbf16, #tpu.memory_space<vmem>>, vector<1x1x1x32x16xbf16>
    %243 = vector.shape_cast %242 : vector<1x1x1x32x16xbf16> to vector<32x16xbf16>
    %cst_168 = arith.constant dense<0.000000e+00> : vector<16x16xf32>
    %244 = tpu.matmul %233, %243, %cst_168 {dimension_numbers = #tpu.dot_dimension_numbers<[1], [0], [0], [1], [0, 0, 1, 1], [], []>} : vector<16x32xbf16>, vector<32x16xbf16>, vector<16x16xf32> -> vector<16x16xf32>
    %c1_169 = arith.constant 1 : index
    %c1_170 = arith.constant 1 : index
    %c0_171 = arith.constant 0 : index
    %c0_172 = arith.constant 0 : index
    %c0_173 = arith.constant 0 : index
    %245 = vector.load %arg5[%c1_169, %c1_170, %c0_171, %c0_172, %c0_173] : memref<2x3x2x1x16xf32, #tpu.memory_space<vmem>>, vector<1x1x1x1x16xf32>
    %246 = vector.shape_cast %245 : vector<1x1x1x1x16xf32> to vector<1x16xf32>
    %247 = vector.broadcast %246 : vector<1x16xf32> to vector<16x16xf32>
    %248 = arith.addf %244, %247 : vector<16x16xf32>
    %249 = vector.shape_cast %248 : vector<16x16xf32> to vector<2x8x16xf32>
    %c1_174 = arith.constant 1 : index
    %c2_175 = arith.constant 2 : index
    %c0_176 = arith.constant 0 : index
    %c0_177 = arith.constant 0 : index
    %c0_178 = arith.constant 0 : index
    %250 = vector.load %arg4[%c1_174, %c2_175, %c0_176, %c0_177, %c0_178] : memref<2x3x2x32x16xbf16, #tpu.memory_space<vmem>>, vector<1x1x1x32x16xbf16>
    %251 = vector.shape_cast %250 : vector<1x1x1x32x16xbf16> to vector<32x16xbf16>
    %cst_179 = arith.constant dense<0.000000e+00> : vector<16x16xf32>
    %252 = tpu.matmul %233, %251, %cst_179 {dimension_numbers = #tpu.dot_dimension_numbers<[1], [0], [0], [1], [0, 0, 1, 1], [], []>} : vector<16x32xbf16>, vector<32x16xbf16>, vector<16x16xf32> -> vector<16x16xf32>
    %c1_180 = arith.constant 1 : index
    %c2_181 = arith.constant 2 : index
    %c0_182 = arith.constant 0 : index
    %c0_183 = arith.constant 0 : index
    %c0_184 = arith.constant 0 : index
    %253 = vector.load %arg5[%c1_180, %c2_181, %c0_182, %c0_183, %c0_184] : memref<2x3x2x1x16xf32, #tpu.memory_space<vmem>>, vector<1x1x1x1x16xf32>
    %254 = vector.shape_cast %253 : vector<1x1x1x1x16xf32> to vector<1x16xf32>
    %255 = vector.broadcast %254 : vector<1x16xf32> to vector<16x16xf32>
    %256 = arith.addf %252, %255 : vector<16x16xf32>
    %257 = vector.shape_cast %256 : vector<16x16xf32> to vector<2x8x16xf32>
    %258 = arith.truncf %241 : vector<2x8x16xf32> to vector<2x8x16xbf16>
    %259 = arith.truncf %249 : vector<2x8x16xf32> to vector<2x8x16xbf16>
    "tpu.trace_start"() <{level = 10 : i32, message = "bqd,bkd->bqk"}> : () -> ()
    %cst_185 = arith.constant dense<0.000000e+00> : vector<2x8x8xf32>
    %260 = tpu.matmul %258, %259, %cst_185 {dimension_numbers = #tpu.dot_dimension_numbers<[2], [2], [1], [1], [0, 0, 0, 1, 1, 1], [0], [0]>} : vector<2x8x16xbf16>, vector<2x8x16xbf16>, vector<2x8x8xf32> -> vector<2x8x8xf32>
    "tpu.trace_stop"() : () -> ()
    %cst_186 = arith.constant 2.500000e-01 : f32
    %261 = vector.broadcast %cst_186 : f32 to vector<2x8x8xf32>
    %262 = arith.mulf %260, %261 : vector<2x8x8xf32>
    %263 = vector.broadcast %49 : vector<2x1x8xf32> to vector<2x8x8xf32>
    %264 = arith.addf %262, %263 : vector<2x8x8xf32>
    %cst_187 = arith.constant dense<0xFF800000> : vector<2x8xf32>
    %265 = vector.multi_reduction <maximumf>, %264, %cst_187 [2] : vector<2x8x8xf32> to vector<2x8xf32>
    %266 = vector.shape_cast %265 : vector<2x8xf32> to vector<2x8x1xf32>
    %267 = vector.broadcast %266 : vector<2x8x1xf32> to vector<2x8x8xf32>
    %268 = arith.subf %264, %267 : vector<2x8x8xf32>
    %269 = math.exp %268 : vector<2x8x8xf32>
    %cst_188 = arith.constant dense<0.000000e+00> : vector<2x8xf32>
    %270 = vector.multi_reduction <add>, %269, %cst_188 [2] : vector<2x8x8xf32> to vector<2x8xf32>
    %271 = vector.shape_cast %270 : vector<2x8xf32> to vector<2x8x1xf32>
    %272 = tpu.reciprocal %271 {approx = true} : vector<2x8x1xf32> -> vector<2x8x1xf32>
    %273 = vector.broadcast %272 : vector<2x8x1xf32> to vector<2x8x8xf32>
    %274 = arith.mulf %269, %273 : vector<2x8x8xf32>
    %275 = arith.truncf %274 : vector<2x8x8xf32> to vector<2x8x8xbf16>
    %276 = arith.truncf %257 : vector<2x8x16xf32> to vector<2x8x16xbf16>
    "tpu.trace_start"() <{level = 10 : i32, message = "bqk,bkd->bqd"}> : () -> ()
    %cst_189 = arith.constant dense<0.000000e+00> : vector<2x8x16xf32>
    %277 = tpu.matmul %275, %276, %cst_189 {dimension_numbers = #tpu.dot_dimension_numbers<[2], [1], [1], [2], [0, 0, 0, 1, 1, 2], [0], [0]>} : vector<2x8x8xbf16>, vector<2x8x16xbf16>, vector<2x8x16xf32> -> vector<2x8x16xf32>
    "tpu.trace_stop"() : () -> ()
    %278 = vector.shape_cast %277 : vector<2x8x16xf32> to vector<16x16xf32>
    %279 = arith.truncf %278 : vector<16x16xf32> to vector<16x16xbf16>
    %c1_190 = arith.constant 1 : index
    %c0_191 = arith.constant 0 : index
    %c0_192 = arith.constant 0 : index
    %c0_193 = arith.constant 0 : index
    %280 = vector.load %arg6[%c1_190, %c0_191, %c0_192, %c0_193] : memref<2x2x16x32xbf16, #tpu.memory_space<vmem>>, vector<1x1x16x32xbf16>
    %281 = vector.shape_cast %280 : vector<1x1x16x32xbf16> to vector<16x32xbf16>
    %cst_194 = arith.constant dense<0.000000e+00> : vector<16x32xf32>
    %282 = tpu.matmul %279, %281, %cst_194 {dimension_numbers = #tpu.dot_dimension_numbers<[1], [0], [0], [1], [0, 0, 1, 1], [], []>} : vector<16x16xbf16>, vector<16x32xbf16>, vector<16x32xf32> -> vector<16x32xf32>
    %c1_195 = arith.constant 1 : index
    %c0_196 = arith.constant 0 : index
    %c1_197 = arith.constant 1 : index
    %c0_198 = arith.constant 0 : index
    %c0_199 = arith.constant 0 : index
    %283 = vector.load %arg4[%c1_195, %c0_196, %c1_197, %c0_198, %c0_199] : memref<2x3x2x32x16xbf16, #tpu.memory_space<vmem>>, vector<1x1x1x32x16xbf16>
    %284 = vector.shape_cast %283 : vector<1x1x1x32x16xbf16> to vector<32x16xbf16>
    %cst_200 = arith.constant dense<0.000000e+00> : vector<16x16xf32>
    %285 = tpu.matmul %233, %284, %cst_200 {dimension_numbers = #tpu.dot_dimension_numbers<[1], [0], [0], [1], [0, 0, 1, 1], [], []>} : vector<16x32xbf16>, vector<32x16xbf16>, vector<16x16xf32> -> vector<16x16xf32>
    %c1_201 = arith.constant 1 : index
    %c0_202 = arith.constant 0 : index
    %c1_203 = arith.constant 1 : index
    %c0_204 = arith.constant 0 : index
    %c0_205 = arith.constant 0 : index
    %286 = vector.load %arg5[%c1_201, %c0_202, %c1_203, %c0_204, %c0_205] : memref<2x3x2x1x16xf32, #tpu.memory_space<vmem>>, vector<1x1x1x1x16xf32>
    %287 = vector.shape_cast %286 : vector<1x1x1x1x16xf32> to vector<1x16xf32>
    %288 = vector.broadcast %287 : vector<1x16xf32> to vector<16x16xf32>
    %289 = arith.addf %285, %288 : vector<16x16xf32>
    %290 = vector.shape_cast %289 : vector<16x16xf32> to vector<2x8x16xf32>
    %c1_206 = arith.constant 1 : index
    %c1_207 = arith.constant 1 : index
    %c1_208 = arith.constant 1 : index
    %c0_209 = arith.constant 0 : index
    %c0_210 = arith.constant 0 : index
    %291 = vector.load %arg4[%c1_206, %c1_207, %c1_208, %c0_209, %c0_210] : memref<2x3x2x32x16xbf16, #tpu.memory_space<vmem>>, vector<1x1x1x32x16xbf16>
    %292 = vector.shape_cast %291 : vector<1x1x1x32x16xbf16> to vector<32x16xbf16>
    %cst_211 = arith.constant dense<0.000000e+00> : vector<16x16xf32>
    %293 = tpu.matmul %233, %292, %cst_211 {dimension_numbers = #tpu.dot_dimension_numbers<[1], [0], [0], [1], [0, 0, 1, 1], [], []>} : vector<16x32xbf16>, vector<32x16xbf16>, vector<16x16xf32> -> vector<16x16xf32>
    %c1_212 = arith.constant 1 : index
    %c1_213 = arith.constant 1 : index
    %c1_214 = arith.constant 1 : index
    %c0_215 = arith.constant 0 : index
    %c0_216 = arith.constant 0 : index
    %294 = vector.load %arg5[%c1_212, %c1_213, %c1_214, %c0_215, %c0_216] : memref<2x3x2x1x16xf32, #tpu.memory_space<vmem>>, vector<1x1x1x1x16xf32>
    %295 = vector.shape_cast %294 : vector<1x1x1x1x16xf32> to vector<1x16xf32>
    %296 = vector.broadcast %295 : vector<1x16xf32> to vector<16x16xf32>
    %297 = arith.addf %293, %296 : vector<16x16xf32>
    %298 = vector.shape_cast %297 : vector<16x16xf32> to vector<2x8x16xf32>
    %c1_217 = arith.constant 1 : index
    %c2_218 = arith.constant 2 : index
    %c1_219 = arith.constant 1 : index
    %c0_220 = arith.constant 0 : index
    %c0_221 = arith.constant 0 : index
    %299 = vector.load %arg4[%c1_217, %c2_218, %c1_219, %c0_220, %c0_221] : memref<2x3x2x32x16xbf16, #tpu.memory_space<vmem>>, vector<1x1x1x32x16xbf16>
    %300 = vector.shape_cast %299 : vector<1x1x1x32x16xbf16> to vector<32x16xbf16>
    %cst_222 = arith.constant dense<0.000000e+00> : vector<16x16xf32>
    %301 = tpu.matmul %233, %300, %cst_222 {dimension_numbers = #tpu.dot_dimension_numbers<[1], [0], [0], [1], [0, 0, 1, 1], [], []>} : vector<16x32xbf16>, vector<32x16xbf16>, vector<16x16xf32> -> vector<16x16xf32>
    %c1_223 = arith.constant 1 : index
    %c2_224 = arith.constant 2 : index
    %c1_225 = arith.constant 1 : index
    %c0_226 = arith.constant 0 : index
    %c0_227 = arith.constant 0 : index
    %302 = vector.load %arg5[%c1_223, %c2_224, %c1_225, %c0_226, %c0_227] : memref<2x3x2x1x16xf32, #tpu.memory_space<vmem>>, vector<1x1x1x1x16xf32>
    %303 = vector.shape_cast %302 : vector<1x1x1x1x16xf32> to vector<1x16xf32>
    %304 = vector.broadcast %303 : vector<1x16xf32> to vector<16x16xf32>
    %305 = arith.addf %301, %304 : vector<16x16xf32>
    %306 = vector.shape_cast %305 : vector<16x16xf32> to vector<2x8x16xf32>
    %307 = arith.truncf %290 : vector<2x8x16xf32> to vector<2x8x16xbf16>
    %308 = arith.truncf %298 : vector<2x8x16xf32> to vector<2x8x16xbf16>
    "tpu.trace_start"() <{level = 10 : i32, message = "bqd,bkd->bqk"}> : () -> ()
    %cst_228 = arith.constant dense<0.000000e+00> : vector<2x8x8xf32>
    %309 = tpu.matmul %307, %308, %cst_228 {dimension_numbers = #tpu.dot_dimension_numbers<[2], [2], [1], [1], [0, 0, 0, 1, 1, 1], [0], [0]>} : vector<2x8x16xbf16>, vector<2x8x16xbf16>, vector<2x8x8xf32> -> vector<2x8x8xf32>
    "tpu.trace_stop"() : () -> ()
    %cst_229 = arith.constant 2.500000e-01 : f32
    %310 = vector.broadcast %cst_229 : f32 to vector<2x8x8xf32>
    %311 = arith.mulf %309, %310 : vector<2x8x8xf32>
    %312 = vector.broadcast %49 : vector<2x1x8xf32> to vector<2x8x8xf32>
    %313 = arith.addf %311, %312 : vector<2x8x8xf32>
    %cst_230 = arith.constant dense<0xFF800000> : vector<2x8xf32>
    %314 = vector.multi_reduction <maximumf>, %313, %cst_230 [2] : vector<2x8x8xf32> to vector<2x8xf32>
    %315 = vector.shape_cast %314 : vector<2x8xf32> to vector<2x8x1xf32>
    %316 = vector.broadcast %315 : vector<2x8x1xf32> to vector<2x8x8xf32>
    %317 = arith.subf %313, %316 : vector<2x8x8xf32>
    %318 = math.exp %317 : vector<2x8x8xf32>
    %cst_231 = arith.constant dense<0.000000e+00> : vector<2x8xf32>
    %319 = vector.multi_reduction <add>, %318, %cst_231 [2] : vector<2x8x8xf32> to vector<2x8xf32>
    %320 = vector.shape_cast %319 : vector<2x8xf32> to vector<2x8x1xf32>
    %321 = tpu.reciprocal %320 {approx = true} : vector<2x8x1xf32> -> vector<2x8x1xf32>
    %322 = vector.broadcast %321 : vector<2x8x1xf32> to vector<2x8x8xf32>
    %323 = arith.mulf %318, %322 : vector<2x8x8xf32>
    %324 = arith.truncf %323 : vector<2x8x8xf32> to vector<2x8x8xbf16>
    %325 = arith.truncf %306 : vector<2x8x16xf32> to vector<2x8x16xbf16>
    "tpu.trace_start"() <{level = 10 : i32, message = "bqk,bkd->bqd"}> : () -> ()
    %cst_232 = arith.constant dense<0.000000e+00> : vector<2x8x16xf32>
    %326 = tpu.matmul %324, %325, %cst_232 {dimension_numbers = #tpu.dot_dimension_numbers<[2], [1], [1], [2], [0, 0, 0, 1, 1, 2], [0], [0]>} : vector<2x8x8xbf16>, vector<2x8x16xbf16>, vector<2x8x16xf32> -> vector<2x8x16xf32>
    "tpu.trace_stop"() : () -> ()
    %327 = vector.shape_cast %326 : vector<2x8x16xf32> to vector<16x16xf32>
    %328 = arith.truncf %327 : vector<16x16xf32> to vector<16x16xbf16>
    %c1_233 = arith.constant 1 : index
    %c1_234 = arith.constant 1 : index
    %c0_235 = arith.constant 0 : index
    %c0_236 = arith.constant 0 : index
    %329 = vector.load %arg6[%c1_233, %c1_234, %c0_235, %c0_236] : memref<2x2x16x32xbf16, #tpu.memory_space<vmem>>, vector<1x1x16x32xbf16>
    %330 = vector.shape_cast %329 : vector<1x1x16x32xbf16> to vector<16x32xbf16>
    %cst_237 = arith.constant dense<0.000000e+00> : vector<16x32xf32>
    %331 = tpu.matmul %328, %330, %cst_237 {dimension_numbers = #tpu.dot_dimension_numbers<[1], [0], [0], [1], [0, 0, 1, 1], [], []>} : vector<16x16xbf16>, vector<16x32xbf16>, vector<16x32xf32> -> vector<16x32xf32>
    %332 = arith.addf %282, %331 : vector<16x32xf32>
    %c8 = arith.constant 8 : index
    %c0_238 = arith.constant 0 : index
    %c0_239 = arith.constant 0 : index
    %333 = vector.load %arg9[%c8, %c0_238, %c0_239] : memref<18x1x32xf32, #tpu.memory_space<vmem>>, vector<1x1x32xf32>
    %334 = vector.shape_cast %333 : vector<1x1x32xf32> to vector<1x32xf32>
    %335 = vector.broadcast %334 : vector<1x32xf32> to vector<16x32xf32>
    %336 = arith.addf %332, %335 : vector<16x32xf32>
    %337 = arith.addf %232, %336 : vector<16x32xf32>
    %c9 = arith.constant 9 : index
    %c0_240 = arith.constant 0 : index
    %c0_241 = arith.constant 0 : index
    %338 = vector.load %arg9[%c9, %c0_240, %c0_241] : memref<18x1x32xf32, #tpu.memory_space<vmem>>, vector<1x1x32xf32>
    %339 = vector.shape_cast %338 : vector<1x1x32xf32> to vector<1x32xf32>
    %c10 = arith.constant 10 : index
    %c0_242 = arith.constant 0 : index
    %c0_243 = arith.constant 0 : index
    %340 = vector.load %arg9[%c10, %c0_242, %c0_243] : memref<18x1x32xf32, #tpu.memory_space<vmem>>, vector<1x1x32xf32>
    %341 = vector.shape_cast %340 : vector<1x1x32xf32> to vector<1x32xf32>
    %cst_244 = arith.constant dense<0.000000e+00> : vector<16xf32>
    %342 = vector.multi_reduction <add>, %337, %cst_244 [1] : vector<16x32xf32> to vector<16xf32>
    %343 = vector.shape_cast %342 : vector<16xf32> to vector<16x1xf32>
    %cst_245 = arith.constant 3.200000e+01 : f32
    %344 = vector.broadcast %cst_245 : f32 to vector<16x1xf32>
    %345 = arith.divf %343, %344 : vector<16x1xf32>
    %346 = vector.broadcast %345 : vector<16x1xf32> to vector<16x32xf32>
    %347 = arith.subf %337, %346 : vector<16x32xf32>
    %348 = arith.mulf %347, %347 : vector<16x32xf32>
    %cst_246 = arith.constant dense<0.000000e+00> : vector<16xf32>
    %349 = vector.multi_reduction <add>, %348, %cst_246 [1] : vector<16x32xf32> to vector<16xf32>
    %350 = vector.shape_cast %349 : vector<16xf32> to vector<16x1xf32>
    %cst_247 = arith.constant 3.200000e+01 : f32
    %351 = vector.broadcast %cst_247 : f32 to vector<16x1xf32>
    %352 = arith.divf %350, %351 : vector<16x1xf32>
    %cst_248 = arith.constant 9.99999996E-13 : f32
    %353 = vector.broadcast %cst_248 : f32 to vector<16x1xf32>
    %354 = arith.addf %352, %353 : vector<16x1xf32>
    %355 = math.rsqrt %354 : vector<16x1xf32>
    %356 = vector.broadcast %355 : vector<16x1xf32> to vector<16x32xf32>
    %357 = arith.mulf %347, %356 : vector<16x32xf32>
    %358 = vector.broadcast %339 : vector<1x32xf32> to vector<16x32xf32>
    %359 = arith.mulf %358, %357 : vector<16x32xf32>
    %360 = vector.broadcast %341 : vector<1x32xf32> to vector<16x32xf32>
    %361 = arith.addf %359, %360 : vector<16x32xf32>
    %362 = arith.truncf %361 : vector<16x32xf32> to vector<16x32xbf16>
    %c1_249 = arith.constant 1 : index
    %c0_250 = arith.constant 0 : index
    %c0_251 = arith.constant 0 : index
    %c0_252 = arith.constant 0 : index
    %363 = vector.load %arg7[%c1_249, %c0_250, %c0_251, %c0_252] : memref<2x2x32x64xbf16, #tpu.memory_space<vmem>>, vector<1x1x32x64xbf16>
    %364 = vector.shape_cast %363 : vector<1x1x32x64xbf16> to vector<32x64xbf16>
    %cst_253 = arith.constant dense<0.000000e+00> : vector<16x64xf32>
    %365 = tpu.matmul %362, %364, %cst_253 {dimension_numbers = #tpu.dot_dimension_numbers<[1], [0], [0], [1], [0, 0, 1, 1], [], []>} : vector<16x32xbf16>, vector<32x64xbf16>, vector<16x64xf32> -> vector<16x64xf32>
    %c1_254 = arith.constant 1 : index
    %c0_255 = arith.constant 0 : index
    %c0_256 = arith.constant 0 : index
    %366 = vector.load %arg8[%c1_254, %c0_255, %c0_256] : memref<2x1x64xf32, #tpu.memory_space<vmem>>, vector<1x1x64xf32>
    %367 = vector.shape_cast %366 : vector<1x1x64xf32> to vector<1x64xf32>
    %368 = vector.broadcast %367 : vector<1x64xf32> to vector<16x64xf32>
    %369 = arith.addf %365, %368 : vector<16x64xf32>
    %cst_257 = arith.constant 5.000000e-01 : f32
    %370 = vector.broadcast %cst_257 : f32 to vector<16x64xf32>
    %371 = arith.mulf %370, %369 : vector<16x64xf32>
    %cst_258 = arith.constant 4.471500e-02 : f32
    %372 = vector.broadcast %cst_258 : f32 to vector<16x64xf32>
    %373 = arith.mulf %372, %369 : vector<16x64xf32>
    %374 = arith.mulf %373, %369 : vector<16x64xf32>
    %375 = arith.mulf %374, %369 : vector<16x64xf32>
    %376 = arith.addf %369, %375 : vector<16x64xf32>
    %cst_259 = arith.constant 0.797884583 : f32
    %377 = vector.broadcast %cst_259 : f32 to vector<16x64xf32>
    %378 = arith.mulf %377, %376 : vector<16x64xf32>
    %379 = math.tanh %378 : vector<16x64xf32>
    %cst_260 = arith.constant 1.000000e+00 : f32
    %380 = vector.broadcast %cst_260 : f32 to vector<16x64xf32>
    %381 = arith.addf %380, %379 : vector<16x64xf32>
    %382 = arith.mulf %371, %381 : vector<16x64xf32>
    %383 = arith.truncf %382 : vector<16x64xf32> to vector<16x64xbf16>
    %c1_261 = arith.constant 1 : index
    %c1_262 = arith.constant 1 : index
    %c0_263 = arith.constant 0 : index
    %c0_264 = arith.constant 0 : index
    %384 = vector.load %arg7[%c1_261, %c1_262, %c0_263, %c0_264] : memref<2x2x32x64xbf16, #tpu.memory_space<vmem>>, vector<1x1x32x64xbf16>
    %385 = vector.shape_cast %384 : vector<1x1x32x64xbf16> to vector<32x64xbf16>
    %cst_265 = arith.constant dense<0.000000e+00> : vector<16x32xf32>
    %386 = tpu.matmul %383, %385, %cst_265 {dimension_numbers = #tpu.dot_dimension_numbers<[1], [1], [0], [0], [0, 0, 1, 0], [], []>} : vector<16x64xbf16>, vector<32x64xbf16>, vector<16x32xf32> -> vector<16x32xf32>
    %c11 = arith.constant 11 : index
    %c0_266 = arith.constant 0 : index
    %c0_267 = arith.constant 0 : index
    %387 = vector.load %arg9[%c11, %c0_266, %c0_267] : memref<18x1x32xf32, #tpu.memory_space<vmem>>, vector<1x1x32xf32>
    %388 = vector.shape_cast %387 : vector<1x1x32xf32> to vector<1x32xf32>
    %389 = vector.broadcast %388 : vector<1x32xf32> to vector<16x32xf32>
    %390 = arith.addf %386, %389 : vector<16x32xf32>
    %391 = arith.addf %361, %390 : vector<16x32xf32>
    %c12 = arith.constant 12 : index
    %c0_268 = arith.constant 0 : index
    %c0_269 = arith.constant 0 : index
    %392 = vector.load %arg9[%c12, %c0_268, %c0_269] : memref<18x1x32xf32, #tpu.memory_space<vmem>>, vector<1x1x32xf32>
    %393 = vector.shape_cast %392 : vector<1x1x32xf32> to vector<1x32xf32>
    %c13 = arith.constant 13 : index
    %c0_270 = arith.constant 0 : index
    %c0_271 = arith.constant 0 : index
    %394 = vector.load %arg9[%c13, %c0_270, %c0_271] : memref<18x1x32xf32, #tpu.memory_space<vmem>>, vector<1x1x32xf32>
    %395 = vector.shape_cast %394 : vector<1x1x32xf32> to vector<1x32xf32>
    %cst_272 = arith.constant dense<0.000000e+00> : vector<16xf32>
    %396 = vector.multi_reduction <add>, %391, %cst_272 [1] : vector<16x32xf32> to vector<16xf32>
    %397 = vector.shape_cast %396 : vector<16xf32> to vector<16x1xf32>
    %cst_273 = arith.constant 3.200000e+01 : f32
    %398 = vector.broadcast %cst_273 : f32 to vector<16x1xf32>
    %399 = arith.divf %397, %398 : vector<16x1xf32>
    %400 = vector.broadcast %399 : vector<16x1xf32> to vector<16x32xf32>
    %401 = arith.subf %391, %400 : vector<16x32xf32>
    %402 = arith.mulf %401, %401 : vector<16x32xf32>
    %cst_274 = arith.constant dense<0.000000e+00> : vector<16xf32>
    %403 = vector.multi_reduction <add>, %402, %cst_274 [1] : vector<16x32xf32> to vector<16xf32>
    %404 = vector.shape_cast %403 : vector<16xf32> to vector<16x1xf32>
    %cst_275 = arith.constant 3.200000e+01 : f32
    %405 = vector.broadcast %cst_275 : f32 to vector<16x1xf32>
    %406 = arith.divf %404, %405 : vector<16x1xf32>
    %cst_276 = arith.constant 9.99999996E-13 : f32
    %407 = vector.broadcast %cst_276 : f32 to vector<16x1xf32>
    %408 = arith.addf %406, %407 : vector<16x1xf32>
    %409 = math.rsqrt %408 : vector<16x1xf32>
    %410 = vector.broadcast %409 : vector<16x1xf32> to vector<16x32xf32>
    %411 = arith.mulf %401, %410 : vector<16x32xf32>
    %412 = vector.broadcast %393 : vector<1x32xf32> to vector<16x32xf32>
    %413 = arith.mulf %412, %411 : vector<16x32xf32>
    %414 = vector.broadcast %395 : vector<1x32xf32> to vector<16x32xf32>
    %415 = arith.addf %413, %414 : vector<16x32xf32>
    %416 = tpu.iota {dimensions = array<i32: 0>} : vector<2x16xi32>
    %417 = tpu.iota {dimensions = array<i32: 1>} : vector<2x16xi32>
    %c8_i32 = arith.constant 8 : i32
    %418 = vector.broadcast %c8_i32 : i32 to vector<2x16xi32>
    %419 = arith.muli %416, %418 : vector<2x16xi32>
    %420 = arith.cmpi eq, %417, %419 : vector<2x16xi32>
    %cst_277 = arith.constant 1.000000e+00 : f32
    %cst_278 = arith.constant 0.000000e+00 : f32
    %421 = vector.broadcast %cst_277 : f32 to vector<2x16xf32>
    %422 = vector.broadcast %cst_278 : f32 to vector<2x16xf32>
    %423 = arith.select %420, %421, %422 : vector<2x16xi1>, vector<2x16xf32>
    %cst_279 = arith.constant dense<0.000000e+00> : vector<2x32xf32>
    %424 = tpu.matmul %423, %415, %cst_279 {dimension_numbers = #tpu.dot_dimension_numbers<[1], [0], [0], [1], [0, 0, 1, 1], [], []>} : vector<2x16xf32>, vector<16x32xf32>, vector<2x32xf32> -> vector<2x32xf32>
    %425 = arith.truncf %424 : vector<2x32xf32> to vector<2x32xbf16>
    %c0_280 = arith.constant 0 : index
    %c0_281 = arith.constant 0 : index
    %c0_282 = arith.constant 0 : index
    %426 = vector.load %arg10[%c0_280, %c0_281, %c0_282] : memref<3x32x32xbf16, #tpu.memory_space<vmem>>, vector<1x32x32xbf16>
    %427 = vector.shape_cast %426 : vector<1x32x32xbf16> to vector<32x32xbf16>
    %cst_283 = arith.constant dense<0.000000e+00> : vector<2x32xf32>
    %428 = tpu.matmul %425, %427, %cst_283 {dimension_numbers = #tpu.dot_dimension_numbers<[1], [0], [0], [1], [0, 0, 1, 1], [], []>} : vector<2x32xbf16>, vector<32x32xbf16>, vector<2x32xf32> -> vector<2x32xf32>
    %c14 = arith.constant 14 : index
    %c0_284 = arith.constant 0 : index
    %c0_285 = arith.constant 0 : index
    %429 = vector.load %arg9[%c14, %c0_284, %c0_285] : memref<18x1x32xf32, #tpu.memory_space<vmem>>, vector<1x1x32xf32>
    %430 = vector.shape_cast %429 : vector<1x1x32xf32> to vector<1x32xf32>
    %431 = vector.broadcast %430 : vector<1x32xf32> to vector<2x32xf32>
    %432 = arith.addf %428, %431 : vector<2x32xf32>
    %433 = math.tanh %432 : vector<2x32xf32>
    %434 = arith.truncf %433 : vector<2x32xf32> to vector<2x32xbf16>
    %c2_286 = arith.constant 2 : index
    %c0_287 = arith.constant 0 : index
    %c0_288 = arith.constant 0 : index
    %435 = vector.load %arg10[%c2_286, %c0_287, %c0_288] : memref<3x32x32xbf16, #tpu.memory_space<vmem>>, vector<1x32x32xbf16>
    %436 = vector.shape_cast %435 : vector<1x32x32xbf16> to vector<32x32xbf16>
    %cst_289 = arith.constant dense<0.000000e+00> : vector<2x32xf32>
    %437 = tpu.matmul %434, %436, %cst_289 {dimension_numbers = #tpu.dot_dimension_numbers<[1], [0], [0], [1], [0, 0, 1, 1], [], []>} : vector<2x32xbf16>, vector<32x32xbf16>, vector<2x32xf32> -> vector<2x32xf32>
    %438 = vector.extract_strided_slice %437 {offsets = [0, 0], sizes = [2, 2], strides = [1, 1]} : vector<2x32xf32> to vector<2x2xf32>
    %c1_290 = arith.constant 1 : index
    %c0_291 = arith.constant 0 : index
    %c0_292 = arith.constant 0 : index
    %439 = vector.load %arg11[%c1_290, %c0_291, %c0_292] : memref<2x1x50xf32, #tpu.memory_space<vmem>>, vector<1x1x50xf32>
    %440 = vector.shape_cast %439 : vector<1x1x50xf32> to vector<1x50xf32>
    %441 = vector.extract_strided_slice %440 {offsets = [0, 0], sizes = [1, 2], strides = [1, 1]} : vector<1x50xf32> to vector<1x2xf32>
    %442 = vector.broadcast %441 : vector<1x2xf32> to vector<2x2xf32>
    %443 = arith.addf %438, %442 : vector<2x2xf32>
    %c0_293 = arith.constant 0 : index
    %c0_294 = arith.constant 0 : index
    %444 = vector.load %arg13[%c0_293, %c0_294] : memref<2x2xf32, #tpu.memory_space<vmem>>, vector<2x2xf32>
    tpu.vector_store %arg13[%c0_293, %c0_294], %443 {strides = array<i32>} : memref<2x2xf32, #tpu.memory_space<vmem>>, vector<2x2xf32>,
    %445 = tpu.iota {dimensions = array<i32: 1>} : vector<6x16xi32>
    %c0_295 = arith.constant 0 : index
    %c0_296 = arith.constant 0 : index
    %446 = vector.load %arg2[%c0_295, %c0_296] : memref<6x1xi32, #tpu.memory_space<vmem>>, vector<6x1xi32>
    %447 = vector.broadcast %446 : vector<6x1xi32> to vector<6x16xi32>
    %448 = arith.cmpi eq, %445, %447 : vector<6x16xi32>
    %cst_297 = arith.constant 1.000000e+00 : f32
    %cst_298 = arith.constant 0.000000e+00 : f32
    %449 = vector.broadcast %cst_297 : f32 to vector<6x16xf32>
    %450 = vector.broadcast %cst_298 : f32 to vector<6x16xf32>
    %451 = arith.select %448, %449, %450 : vector<6x16xi1>, vector<6x16xf32>
    %cst_299 = arith.constant dense<0.000000e+00> : vector<6x32xf32>
    %452 = tpu.matmul %451, %415, %cst_299 {dimension_numbers = #tpu.dot_dimension_numbers<[1], [0], [0], [1], [0, 0, 1, 1], [], []>} : vector<6x16xf32>, vector<16x32xf32>, vector<6x32xf32> -> vector<6x32xf32>
    %453 = arith.truncf %452 : vector<6x32xf32> to vector<6x32xbf16>
    %c1_300 = arith.constant 1 : index
    %c0_301 = arith.constant 0 : index
    %c0_302 = arith.constant 0 : index
    %454 = vector.load %arg10[%c1_300, %c0_301, %c0_302] : memref<3x32x32xbf16, #tpu.memory_space<vmem>>, vector<1x32x32xbf16>
    %455 = vector.shape_cast %454 : vector<1x32x32xbf16> to vector<32x32xbf16>
    %cst_303 = arith.constant dense<0.000000e+00> : vector<6x32xf32>
    %456 = tpu.matmul %453, %455, %cst_303 {dimension_numbers = #tpu.dot_dimension_numbers<[1], [0], [0], [1], [0, 0, 1, 1], [], []>} : vector<6x32xbf16>, vector<32x32xbf16>, vector<6x32xf32> -> vector<6x32xf32>
    %c15 = arith.constant 15 : index
    %c0_304 = arith.constant 0 : index
    %c0_305 = arith.constant 0 : index
    %457 = vector.load %arg9[%c15, %c0_304, %c0_305] : memref<18x1x32xf32, #tpu.memory_space<vmem>>, vector<1x1x32xf32>
    %458 = vector.shape_cast %457 : vector<1x1x32xf32> to vector<1x32xf32>
    %459 = vector.broadcast %458 : vector<1x32xf32> to vector<6x32xf32>
    %460 = arith.addf %456, %459 : vector<6x32xf32>
    %cst_306 = arith.constant 0.000000e+00 : f32
    %461 = vector.broadcast %cst_306 : f32 to vector<6x32xf32>
    %462 = arith.maximumf %460, %461 : vector<6x32xf32>
    %c16 = arith.constant 16 : index
    %c0_307 = arith.constant 0 : index
    %c0_308 = arith.constant 0 : index
    %463 = vector.load %arg9[%c16, %c0_307, %c0_308] : memref<18x1x32xf32, #tpu.memory_space<vmem>>, vector<1x1x32xf32>
    %464 = vector.shape_cast %463 : vector<1x1x32xf32> to vector<1x32xf32>
    %c17 = arith.constant 17 : index
    %c0_309 = arith.constant 0 : index
    %c0_310 = arith.constant 0 : index
    %465 = vector.load %arg9[%c17, %c0_309, %c0_310] : memref<18x1x32xf32, #tpu.memory_space<vmem>>, vector<1x1x32xf32>
    %466 = vector.shape_cast %465 : vector<1x1x32xf32> to vector<1x32xf32>
    %cst_311 = arith.constant dense<0.000000e+00> : vector<6xf32>
    %467 = vector.multi_reduction <add>, %462, %cst_311 [1] : vector<6x32xf32> to vector<6xf32>
    %468 = vector.shape_cast %467 : vector<6xf32> to vector<6x1xf32>
    %cst_312 = arith.constant 3.200000e+01 : f32
    %469 = vector.broadcast %cst_312 : f32 to vector<6x1xf32>
    %470 = arith.divf %468, %469 : vector<6x1xf32>
    %471 = vector.broadcast %470 : vector<6x1xf32> to vector<6x32xf32>
    %472 = arith.subf %462, %471 : vector<6x32xf32>
    %473 = arith.mulf %472, %472 : vector<6x32xf32>
    %cst_313 = arith.constant dense<0.000000e+00> : vector<6xf32>
    %474 = vector.multi_reduction <add>, %473, %cst_313 [1] : vector<6x32xf32> to vector<6xf32>
    %475 = vector.shape_cast %474 : vector<6xf32> to vector<6x1xf32>
    %cst_314 = arith.constant 3.200000e+01 : f32
    %476 = vector.broadcast %cst_314 : f32 to vector<6x1xf32>
    %477 = arith.divf %475, %476 : vector<6x1xf32>
    %cst_315 = arith.constant 9.99999996E-13 : f32
    %478 = vector.broadcast %cst_315 : f32 to vector<6x1xf32>
    %479 = arith.addf %477, %478 : vector<6x1xf32>
    %480 = math.rsqrt %479 : vector<6x1xf32>
    %481 = vector.broadcast %480 : vector<6x1xf32> to vector<6x32xf32>
    %482 = arith.mulf %472, %481 : vector<6x32xf32>
    %483 = vector.broadcast %464 : vector<1x32xf32> to vector<6x32xf32>
    %484 = arith.mulf %483, %482 : vector<6x32xf32>
    %485 = vector.broadcast %466 : vector<1x32xf32> to vector<6x32xf32>
    %486 = arith.addf %484, %485 : vector<6x32xf32>
    %487 = arith.truncf %486 : vector<6x32xf32> to vector<6x32xbf16>
    %c0_316 = arith.constant 0 : index
    %c0_317 = arith.constant 0 : index
    %488 = vector.load %arg3[%c0_316, %c0_317] : memref<68x32xbf16, #tpu.memory_space<vmem>>, vector<50x32xbf16>
    %cst_318 = arith.constant dense<0.000000e+00> : vector<6x50xf32>
    %489 = tpu.matmul %487, %488, %cst_318 {dimension_numbers = #tpu.dot_dimension_numbers<[1], [1], [0], [0], [0, 0, 1, 0], [], []>} : vector<6x32xbf16>, vector<50x32xbf16>, vector<6x50xf32> -> vector<6x50xf32>
    %c0_319 = arith.constant 0 : index
    %c0_320 = arith.constant 0 : index
    %c0_321 = arith.constant 0 : index
    %490 = vector.load %arg11[%c0_319, %c0_320, %c0_321] : memref<2x1x50xf32, #tpu.memory_space<vmem>>, vector<1x1x50xf32>
    %491 = vector.shape_cast %490 : vector<1x1x50xf32> to vector<1x50xf32>
    %492 = vector.broadcast %491 : vector<1x50xf32> to vector<6x50xf32>
    %493 = arith.addf %489, %492 : vector<6x50xf32>
    %c0_322 = arith.constant 0 : index
    %c0_323 = arith.constant 0 : index
    %494 = vector.load %arg12[%c0_322, %c0_323] : memref<6x50xf32, #tpu.memory_space<vmem>>, vector<6x50xf32>
    tpu.vector_store %arg12[%c0_322, %c0_323], %493 {strides = array<i32>} : memref<6x50xf32, #tpu.memory_space<vmem>>, vector<6x50xf32>,
    return
  }
}

</mosaic_0001>

<bundles_post_ra>
// kernel: generator_forward.1
= control target key start
LH: loop header
LB: loop body
LE: loop exit
PB: predicated region body
PF: predicated region fallthrough
CT: control target
= control target key end

     0   :  { %v3977_v2 = vmov 0   ;;  %v3978_v6 = vmov 0.0   ;;  %vm126_vm0 = vcmask 1041408   ;;  %vm3979_vm1 = vmmov 0   ;;  %s4686_s0 = inlined_call_operand.vmem [shape: s32[3,16,1], index: 0, kind: input, shape index: {}]   ;;  %s4687_s1 = inlined_call_operand.vmem [shape: f32[2,1,8], index: 1, kind: input, shape index: {}]   ;;  %s4688_s2 = inlined_call_operand.vmem [shape: s32[6,1], index: 2, kind: input, shape index: {}]   ;;  %s4689_s3 = inlined_call_operand.vmem [shape: bf16[68,32], index: 3, kind: input, shape index: {}]   ;;  %s4690_s4 = inlined_call_operand.vmem [shape: bf16[2,3,2,32,16], index: 4, kind: input, shape index: {}]   ;;  %s4691_s5 = inlined_call_operand.vmem [shape: f32[2,3,2,1,16], index: 5, kind: input, shape index: {}]   ;;  %s4692_s6 = inlined_call_operand.vmem [shape: bf16[2,2,16,32], index: 6, kind: input, shape index: {}]   ;;  %s4693_s7 = inlined_call_operand.vmem [shape: bf16[2,2,32,64], index: 7, kind: input, shape index: {}]   ;;  %s4694_s8 = inlined_call_operand.vmem [shape: f32[2,1,64], index: 8, kind: input, shape index: {}]   ;;  %s4695_s9 = inlined_call_operand.vmem [shape: f32[18,1,32], index: 9, kind: input, shape index: {}]   ;;  %s4696_s10 = inlined_call_operand.vmem [shape: bf16[3,32,32], index: 10, kind: input, shape index: {}]   ;;  %s4697_s11 = inlined_call_operand.vmem [shape: f32[2,1,50], index: 11, kind: input, shape index: {}]   ;;  %s4698_s12 = inlined_call_operand.vmem [shape: f32[6,50], index: 12, kind: output, shape index: {0}]   ;;  %s4699_s13 = inlined_call_operand.hbm [shape: f32[2,2], index: 13, kind: output, shape index: {1}]  }
   0x1   :  { %v3167_v0 = vld [vmem:[%s4686_s0 + $0x10] sm:$0xff]  ;;  %v47_v1 = vld [vmem:[%s4686_s0] sm:$0xff]  ;;  %3837 = vset.pattern.permute.xlu1 %v3977_v2  ;;  %3836 = vset.pattern.permute.xlu0 %v3977_v2  ;;  %v3168_v3 = vld [vmem:[%s4686_s0 + $0x18] sm:$0xff] }
   0x2   :  { %61 = vperm.xlu1 %3837, %v3167_v0   ;;  %50 = vperm.xlu0 %3836, %v47_v1   ;;  %v3838_v4 = vld [vmem:[%s4689_s3] sm:$0xff]   ;;  %v48_v5 = vld [vmem:[%s4686_s0 + $0x8] sm:$0xff]  ;;  %v3840_v10 = vld [vmem:[%s4689_s3 + $0x10] sm:$0xff]  }
   0x3   :  { %3513 = vmatprep.subr.bf16.mxu0 %v3978_v6  ;;  %3527 = vmatprep.subr.bf16.mxu1 %v3978_v6  ;;  %v3839_v7 = vld [vmem:[%s4689_s3 + $0x8] sm:$0xff]   ;;  %v3169_v9 = vld [vmem:[%s4686_s0 + $0x20] sm:$0xff]  ;;  %v3841_v12 = vld [vmem:[%s4689_s3 + $0x18] sm:$0xff]  }
   0x4   :  { %3514 = vmatpush3.bf16.msra.mxu0 %v3838_v4  ;;  %v3170_v8 = vld [vmem:[%s4686_s0 + $0x28] sm:$0xff]  ;;  %v3842_v11 = vld [vmem:[%s4689_s3 + $0x20] ss:$0 sps:$4 sm:$0x33]   ;;  %3523 = vmatprep.mubr.msk.bf16.mxu0 %vm3979_vm1, %v3978_v6 }
   0x5   :  { %3515 = vmatprep.subr.bf16.mxu0 %v3978_v6  ;;  %v128_v13 = vsel %vm126_vm0, %v3842_v11, 0  ;;  %3531 = vmatprep.mubr.msk.bf16.mxu1 %vm3979_vm1, %v3978_v6 }
   0x6   :  { %64 = vperm.xlu1 %3837, %v3168_v3   ;;  %53 = vperm.xlu0 %3836, %v48_v5  }
   0x8   :  { %3516 = vmatpush3.bf16.msra.mxu0 %v3839_v7 }
   0x9   :  { %3517 = vmatprep.subr.bf16.mxu0 %v3978_v6 }
   0xa   :  { %77 = vperm.xlu1 %3837, %v3170_v8   ;;  %74 = vperm.xlu0 %3836, %v3169_v9  }
   0xc   :  { %3518 = vmatpush3.bf16.msra.mxu0 %v3840_v10 }
   0xd   :  { %3519 = vmatprep.subr.bf16.mxu0 %v3978_v6 }
  0x10   :  { %3520 = vmatpush3.bf16.msra.mxu0 %v3841_v12 }
  0x11   :  { %3521 = vmatprep.subr.bf16.mxu0 %v3978_v6 }
  0x14   :  { %3522 = vmatpush3.bf16.msra.mxu0 %v128_v13 }
  0x15   :  { %3551 = vmatprep.subr.bf16.mxu0 %v3978_v6 }
  0x16   :  { %19 = vsyncpa [#allocation3], 0  ;;  %v45_v14 = vlaneseq  ;;  %vm122_vm12 = vcmask 556032   ;;  %vm174_vm13 = vcmask 261120   ;;  %v3843_v41 = vld [vmem:[%s4690_s4] sm:$0xff]   ;;  %v3844_v42 = vld [vmem:[%s4690_s4 + $0x8] sm:$0xff]  }
  0x17   :  { %3528 = vmatpush3.bf16.msra.mxu1 %v3843_v41  ;;  %v3178_v51 = vld [vmem:[%s4695_s9] ss:$0 sm:$0xff]  ;;  %v3179_v55 = vld [vmem:[%s4695_s9 + $0x1] ss:$0 sm:$0xff]  ;;  %v3846_v61 = vld [vmem:[%s4690_s4 + $0x28] sm:$0xff]   ;;  %vm428_vm14 = vcmask 130048  }
  0x18   :  { %v4097_v17 = vand.u32 127, %v45_v14  ;;  %3529 = vmatprep.subr.bf16.mxu1 %v3978_v6  ;;  %v3845_v59 = vld [vmem:[%s4690_s4 + $0x20] sm:$0xff]   ;;  %v3848_v63 = vld [vmem:[%s4690_s4 + $0x48] sm:$0xff]   ;;  %vm567_vm15 = vcmask 1043456   ;;  %vm537_vm0 = vcmask 64512  }
  0x19   :  { %v3847_v62 = vld [vmem:[%s4690_s4 + $0x40] sm:$0xff]  }
  0x1a   :  { %v3189_v4 = vld [vmem:[%s4691_s5 + $0x2] ss:$0 sm:$0xff]  ;;  %v3180_v13 = vld [vmem:[%s4691_s5] ss:$0 sm:$0xff] }
  0x1b   :  { %3530 = vmatpush3.bf16.msra.mxu1 %v3844_v42 }
  0x1c   :  { %3535 = vmatprep.subr.bf16.mxu1 %v3978_v6 }
  0x81   :  { %v62_v15 = vpop.permute.xlu1 %61  ;;  %v51_v16 = vpop.permute.xlu0 %50 }
  0x82   :  { %vm66_vm2 = vcmp.eq.s32.totalorder %v4097_v17, %v62_v15  ;;  %vm55_vm3 = vcmp.eq.s32.totalorder %v4097_v17, %v51_v16 }
  0x83   :  { %vm68_vm6 = vmor %vm55_vm3, %vm66_vm2  ;;  %vm1348_vm2 = vcmask 523264  }
  0x85   :  { %v65_v18 = vpop.permute.xlu1 %64  ;;  %v54_v19 = vpop.permute.xlu0 %53 }
  0x86   :  { %vm67_vm4 = vcmp.eq.s32.totalorder %v4097_v17, %v65_v18  ;;  %vm56_vm5 = vcmp.eq.s32.totalorder %v4097_v17, %v54_v19  ;;  %v3198_v18 = vld [vmem:[%s4691_s5 + $0x4] ss:$0 sm:$0xff] }
  0x87   :  { %vm69_vm7 = vmor %vm56_vm5, %vm67_vm4  ;;  %vm2876_vm5 = vcmask 9216  }
  0x89   :  { %v78_v20 = vpop.permute.xlu1 %77  ;;  %v75_v21 = vpop.permute.xlu0 %74 }
  0x8a   :  { %vm80_vm8 = vcmp.eq.s32.totalorder %v4097_v17, %v78_v20  ;;  %vm79_vm9 = vcmp.eq.s32.totalorder %v4097_v17, %v75_v21 }
  0x8b   :  { %vm82_vm10 = vmor %vm69_vm7, %vm80_vm8 }
  0x8c   :  { %v84_v22 = vsel %vm82_vm10, 1.0, %v3978_v6  ;;  %vm81_vm11 = vmor %vm68_vm6, %vm79_vm9 }
  0x8d   :  { %v83_v23 = vsel %vm81_vm11, 1.0, %v3978_v6 }
  0x8e   :  { %v85_v24 = vpack.c.bf16 %v84_v22, %v83_v23 }
  0x90   :  { %3524 = vmatmul.mubr.msk.bf16.vlgmr.msra.gmra.mrb[0].mxu0 %vm122_vm12, %v85_v24 }
  0x91   :  { %3553 = vmatprep.mubr.msk.bf16.mxu0 %vm3979_vm1, %v3978_v6 }
 0x163   :  { %v164_v25 = vpop.f32.mrb[0].mxu0 }
 0x164   :  { %v3525_v26 = vpop.f32.mrb[1].mxu0  ;;  %v175_v27 = vsel %vm174_vm13, %v164_v25, 0.0 }
 0x165   :  { %176 = vadd.xlane.f32.xlu0 %v175_v27  ;;  %v167_v28 = vpop.f32.mrb[2].mxu0 }
 0x166   :  { %v3526_v29 = vpop.f32.mrb[3].mxu0  ;;  %v178_v30 = vsel %vm174_vm13, %v167_v28, 0.0 }
 0x167   :  { %179 = vadd.xlane.f32.xlu1 %v178_v30 }
 0x1f2   :  { %v177_v31 = vpop.xlane.xlu0 %176 }
 0x1f3   :  { %v182_v32 = vmul.f32 0.03125, %v177_v31 }
 0x1f4   :  { %v180_v33 = vpop.xlane.xlu1 %179 }
 0x1f5   :  { %v184_v34 = vsub.f32 %v164_v25, %v182_v32  ;;  %v183_v35 = vmul.f32 0.03125, %v180_v33 }
 0x1f7   :  { %v185_v36 = vsub.f32 %v167_v28, %v183_v35  ;;  %v186_v37 = vmul.f32 %v184_v34, %v184_v34  ;;  %v219_v35 = vld [vmem:[%s4687_s1 + $0x1] sm:$0x1] }
 0x1f9   :  { %v188_v38 = vsel %vm174_vm13, %v186_v37, 0.0  ;;  %v187_v39 = vmul.f32 %v185_v36, %v185_v36  ;;  %v4193_v37 = vshrl.u32 %v45_v14, 7 }
 0x1fa   :  { %189 = vadd.xlane.f32.xlu0 %v188_v38  ;;  %v221_v38 = vsub.f32 1.0, %v219_v35 }
 0x1fb   :  { %v191_v40 = vsel %vm174_vm13, %v187_v39, 0.0 }
 0x1fc   :  { %v223_v41 = vmul.f32 -1e+09, %v221_v38 }
 0x1fe   :  { %192 = vadd.xlane.f32.xlu0 %v191_v40  ;;  %v527_v40 = vsub.s32 0, %v4193_v37 }
 0x287   :  { %v190_v43 = vpop.xlane.xlu0 %189 }
 0x288   :  { %v194_v44 = vmul.f32 0.03125, %v190_v43 }
 0x28a   :  { %v196_v45 = vadd.f32 1e-12, %v194_v44 }
 0x28b   :  { %v193_v46 = vpop.xlane.xlu0 %192 }
 0x28c   :  { %3889 = vrsqrt.f32 %v196_v45  ;;  %v195_v47 = vmul.f32 0.03125, %v193_v46  ;;  %v4198_v46 = vrot.slane %v223_v41, %v527_v40 }
 0x28e   :  { %v197_v48 = vadd.f32 1e-12, %v195_v47 }
 0x290   :  { %3891 = vrsqrt.f32 %v197_v48 }
 0x296   :  { %v3890_v49 = vpop.eup %3889 }
 0x297   :  { %v200_v50 = vmul.f32 %v3890_v49, %v184_v34  ;;  %v218_v34 = vld [vmem:[%s4687_s1] sm:$0x1] }
 0x299   :  { %v208_v53 = vmul.f32 %v3178_v51, %v200_v50 }
 0x29a   :  { %v3892_v52 = vpop.eup %3891 }
 0x29b   :  { %v201_v54 = vmul.f32 %v3892_v52, %v185_v36  ;;  %v4127_v57 = vadd.f32 %v3179_v55, %v208_v53  ;;  %v220_v36 = vsub.f32 1.0, %v218_v34 }
 0x29d   :  { %v209_v56 = vmul.f32 %v3178_v51, %v201_v54  ;;  %v222_v39 = vmul.f32 -1e+09, %v220_v36 }
 0x29f   :  { %v4129_v58 = vadd.f32 %v3179_v55, %v209_v56  ;;  %v4196_v42 = vrot.slane %v222_v39, %v527_v40 }
 0x2a1   :  { %v4136_v60 = vpack.c.bf16 %v4129_v58, %v4127_v57 }
 0x2a3   :  { %3532 = vmatmul.mubr.msk.bf16.vlgmr.msra.gmra.mrb[0].mxu1 %vm174_vm13, %v4136_v60 }
 0x2a4   :  { %3536 = vmatpush3.bf16.msra.mxu1 %v3845_v59  ;;  %3539 = vmatprep.mubr.msk.bf16.mxu1 %vm3979_vm1, %v3978_v6 }
 0x2a5   :  { %3537 = vmatprep.subr.bf16.mxu1 %v3978_v6 }
 0x2a8   :  { %3538 = vmatpush3.bf16.msra.mxu1 %v3846_v61 }
 0x2a9   :  { %3543 = vmatprep.subr.bf16.mxu1 %v3978_v6 }
 0x2ab   :  { %3540 = vmatmul.mubr.msk.bf16.vlgmr.msra.gmra.mrb[4].mxu1 %vm174_vm13, %v4136_v60 }
 0x2ac   :  { %3544 = vmatpush3.bf16.msra.mxu1 %v3847_v62  ;;  %3547 = vmatprep.mubr.msk.bf16.mxu1 %vm3979_vm1, %v3978_v6 }
 0x2ad   :  { %3545 = vmatprep.subr.bf16.mxu1 %v3978_v6 }
 0x2b0   :  { %3546 = vmatpush3.bf16.msra.mxu1 %v3848_v63 }
 0x2b1   :  { %3557 = vmatprep.subr.bf16.mxu1 %v3978_v6 }
 0x2b3   :  { %3548 = vmatmul.mubr.msk.bf16.vlgmr.msra.gmra.mrb[8].mxu1 %vm174_vm13, %v4136_v60 }
 0x2b4   :  { %3559 = vmatprep.mubr.msk.bf16.mxu1 %vm3979_vm1, %v3978_v6 }
 0x376   :  { %v285_v0 = vpop.f32.mrb[0].mxu1 }
 0x377   :  { %v3533_v1 = vpop.f32.mrb[1].mxu1  ;;  %v286_v19 = vadd.f32 %v3180_v13, %v285_v0 }
 0x378   :  { %v288_v2 = vpop.f32.mrb[2].mxu1 }
 0x379   :  { %v3534_v3 = vpop.f32.mrb[3].mxu1  ;;  %v289_v22 = vadd.f32 %v3180_v13, %v288_v2  ;;  %v424_v26 = vpack.c.bf16 %v286_v19, %v286_v19  ;;  %v3851_v19 = vld [vmem:[%s4690_s4 + $0x18] sm:$0xff]  }
 0x37b   :  { %v425_v30 = vpack.c.bf16 %v289_v22, %v289_v22  ;;  %v3854_v22 = vld [vmem:[%s4690_s4 + $0x58] sm:$0xff]  }
 0x37e   :  { %v351_v5 = vpop.f32.mrb[4].mxu1 }
 0x37f   :  { %v352_v7 = vadd.f32 %v3189_v4, %v351_v5  ;;  %v3541_v8 = vpop.f32.mrb[5].mxu1 }
 0x380   :  { %v354_v9 = vpop.f32.mrb[6].mxu1 }
 0x381   :  { %v426_v10 = vpack.c.bf16 %v352_v7, %v352_v7  ;;  %v355_v11 = vadd.f32 %v3189_v4, %v354_v9  ;;  %v3542_v12 = vpop.f32.mrb[7].mxu1 }
 0x382   :  { %v3849_v12 = vld [vmem:[%s4690_s4 + $0x10] sm:$0xff]  }
 0x383   :  { %v433_v15 = vsel %vm428_vm14, %v426_v10, 0  ;;  %v427_v16 = vpack.c.bf16 %v355_v11, %v355_v11 }
 0x384   :  { %3552 = vmatpush3.bf16.xpose.msra.mxu0 %v433_v15 }
 0x385   :  { %v479_v20 = vsel %vm428_vm14, %v427_v16, 0  ;;  %3563 = vmatprep.subr.bf16.mxu0 %v3978_v6  ;;  %v3850_v16 = vld [vmem:[%s4690_s4 + $0x30] sm:$0xff]  }
 0x386   :  { %v417_v21 = vpop.f32.mrb[8].mxu1  ;;  %3558 = vmatpush3.bf16.xpose.msra.mxu1 %v479_v20  ;;  %v3852_v20 = vld [vmem:[%s4690_s4 + $0x38] sm:$0xff]  }
 0x387   :  { %v418_v23 = vadd.f32 %v3198_v18, %v417_v21  ;;  %v3549_v24 = vpop.f32.mrb[9].mxu1  ;;  %3569 = vmatprep.subr.bf16.mxu1 %v3978_v6  ;;  %v3853_v21 = vld [vmem:[%s4690_s4 + $0x50] sm:$0xff]  }
 0x388   :  { %v420_v25 = vpop.f32.mrb[10].mxu1 }
 0x389   :  { %v562_v27 = vpack.c.bf16 %v418_v23, %v418_v23  ;;  %v421_v28 = vadd.f32 %v3198_v18, %v420_v25  ;;  %v3550_v29 = vpop.f32.mrb[11].mxu1 }
 0x38b   :  { %v569_v31 = vsel %vm567_vm15, %v562_v27, 0  ;;  %v563_v32 = vpack.c.bf16 %v421_v28, %v421_v28  ;;  %3554 = vmatmul.mubr.msk.bf16.vlgmr.msra.gmra.mrb[4].mxu0 %vm428_vm14, %v424_v26 }
 0x38c   :  { %3564 = vmatpush3.bf16.msra.mxu0 %v569_v31  ;;  %3565 = vmatprep.mubr.msk.bf16.mxu0 %vm3979_vm1, %v3978_v6 }
 0x38d   :  { %v615_v33 = vsel %vm567_vm15, %v563_v32, 0  ;;  %3560 = vmatmul.mubr.msk.bf16.vlgmr.msra.gmra.mrb[12].mxu1 %vm428_vm14, %v425_v30  ;;  %3575 = vmatprep.subr.bf16.mxu0 %v3978_v6 }
 0x38e   :  { %3570 = vmatpush3.bf16.msra.mxu1 %v615_v33  ;;  %3571 = vmatprep.mubr.msk.bf16.mxu1 %vm3979_vm1, %v3978_v6 }
 0x38f   :  { %3583 = vmatprep.subr.bf16.mxu1 %v3978_v6 }
 0x45e   :  { %v469_v43 = vpop.f32.mrb[4].mxu0 }
 0x45f   :  { %v521_v44 = vmul.f32 0.25, %v469_v43  ;;  %v3555_v45 = vpop.f32.mrb[5].mxu0 }
 0x460   :  { %v472_v47 = vpop.f32.mrb[6].mxu0  ;;  %v515_v48 = vpop.f32.mrb[12].mxu1  ;;  %v3211_v45 = vld [vmem:[%s4691_s5 + $0x1] ss:$0 sm:$0xff] }
 0x461   :  { %v522_v49 = vmul.f32 0.25, %v515_v48  ;;  %v3556_v50 = vpop.f32.mrb[7].mxu0  ;;  %v3561_v51 = vpop.f32.mrb[13].mxu1  ;;  %v535_v14 = vadd.f32 %v4196_v42, %v521_v44  ;;  %v3229_v47 = vld [vmem:[%s4691_s5 + $0x5] ss:$0 sm:$0xff] }
 0x462   :  { %v518_v52 = vpop.f32.mrb[14].mxu1 }
 0x463   :  { %v3562_v53 = vpop.f32.mrb[15].mxu1  ;;  %v538_v54 = vsel %vm537_vm0, %v535_v14, -inf  ;;  %v536_v55 = vadd.f32 %v4198_v46, %v522_v49 }
 0x464   :  { %539 = vmax.xlane.f32.xlu0 %v538_v54 }
 0x465   :  { %v541_v56 = vsel %vm537_vm0, %v536_v55, -inf }
 0x466   :  { %542 = vmax.xlane.f32.xlu1 %v541_v56 }
 0x4f1   :  { %v540_v59 = vpop.xlane.xlu0 %539 }
 0x4f2   :  { %v544_v61 = vsub.f32 %v535_v14, %v540_v59 }
 0x4f3   :  { %v543_v62 = vpop.xlane.xlu1 %542 }
 0x4f4   :  { %v546_v63 = vmul.f32 1.442695, %v544_v61  ;;  %v545_v0 = vsub.f32 %v536_v55, %v543_v62 }
 0x4f6   :  { %3893 = vpow2.f32 %v546_v63  ;;  %v548_v1 = vmul.f32 1.442695, %v545_v0 }
 0x4f8   :  { %3895 = vpow2.f32 %v548_v1 }
 0x500   :  { %v3894_v2 = vpop.eup %3893 }
 0x501   :  { %v550_v3 = vsel %vm537_vm0, %v3894_v2, 0.0 }
 0x502   :  { %v3896_v4 = vpop.eup %3895  ;;  %551 = vadd.xlane.f32.xlu0 %v550_v3 }
 0x503   :  { %v553_v5 = vsel %vm537_vm0, %v3896_v4, 0.0 }
 0x504   :  { %554 = vadd.xlane.f32.xlu1 %v553_v5 }
 0x58f   :  { %v552_v7 = vpop.xlane.xlu0 %551 }
 0x590   :  { %3897 = vrcp.f32 %v552_v7 }
 0x591   :  { %v555_v8 = vpop.xlane.xlu1 %554 }
 0x592   :  { %3899 = vrcp.f32 %v555_v8 }
 0x59a   :  { %v3898_v9 = vpop.eup %3897 }
 0x59b   :  { %v558_v10 = vmul.f32 %v3898_v9, %v3894_v2 }
 0x59c   :  { %v3900_v11 = vpop.eup %3899 }
 0x59d   :  { %v559_v13 = vmul.f32 %v3900_v11, %v3896_v4  ;;  %v560_v15 = vpack.c.bf16 %v558_v10, %v558_v10 }
 0x59f   :  { %3566 = vmatmul.mubr.msk.bf16.vlgmr.msra.gmra.mrb[8].mxu0 %vm537_vm0, %v560_v15  ;;  %v561_v18 = vpack.c.bf16 %v559_v13, %v559_v13 }
 0x5a0   :  { %3576 = vmatpush3.bf16.msra.mxu0 %v3849_v12  ;;  %3579 = vmatprep.mubr.msk.bf16.mxu0 %vm3979_vm1, %v3978_v6 }
 0x5a1   :  { %3572 = vmatmul.mubr.msk.bf16.vlgmr.msra.gmra.mrb[16].mxu1 %vm537_vm0, %v561_v18  ;;  %3577 = vmatprep.subr.bf16.mxu0 %v3978_v6 }
 0x5a2   :  { %3584 = vmatpush3.bf16.msra.mxu1 %v3850_v16  ;;  %3587 = vmatprep.mubr.msk.bf16.mxu1 %vm3979_vm1, %v3978_v6 }
 0x5a3   :  { %3585 = vmatprep.subr.bf16.mxu1 %v3978_v6 }
 0x5a4   :  { %3578 = vmatpush3.bf16.msra.mxu0 %v3851_v19 }
 0x5a5   :  { %3591 = vmatprep.subr.bf16.mxu0 %v3978_v6 }
 0x5a6   :  { %3586 = vmatpush3.bf16.msra.mxu1 %v3852_v20 }
 0x5a7   :  { %3580 = vmatmul.mubr.msk.bf16.vlgmr.msra.gmra.mrb[12].mxu0 %vm174_vm13, %v4136_v60  ;;  %3599 = vmatprep.subr.bf16.mxu1 %v3978_v6 }
 0x5a8   :  { %3592 = vmatpush3.bf16.msra.mxu0 %v3853_v21  ;;  %3595 = vmatprep.mubr.msk.bf16.mxu0 %vm3979_vm1, %v3978_v6 }
 0x5a9   :  { %3588 = vmatmul.mubr.msk.bf16.vlgmr.msra.gmra.mrb[20].mxu1 %vm174_vm13, %v4136_v60  ;;  %3593 = vmatprep.subr.bf16.mxu0 %v3978_v6 }
 0x5aa   :  { %3601 = vmatprep.mubr.msk.bf16.mxu1 %vm3979_vm1, %v3978_v6 }
 0x5ac   :  { %3594 = vmatpush3.bf16.msra.mxu0 %v3854_v22 }
 0x5ad   :  { %3605 = vmatprep.subr.bf16.mxu0 %v3978_v6 }
 0x5af   :  { %3596 = vmatmul.mubr.msk.bf16.vlgmr.msra.gmra.mrb[16].mxu0 %vm174_vm13, %v4136_v60  ;;  %v3220_v60 = vld [vmem:[%s4691_s5 + $0x3] ss:$0 sm:$0xff] }
 0x5b0   :  { %3607 = vmatprep.mubr.msk.bf16.mxu0 %vm3979_vm1, %v3978_v6 }
 0x672   :  { %v4248_v23 = vpop.f32.mrb[8].mxu0 }
 0x673   :  { %v3567_v24 = vpop.f32.mrb[9].mxu0 }
 0x674   :  { %v608_v25 = vpop.f32.mrb[10].mxu0  ;;  %v4250_v26 = vpop.f32.mrb[16].mxu1 }
 0x675   :  { %v657_v27 = vpack.c.bf16 %v4250_v26, %v4248_v23  ;;  %v3568_v28 = vpop.f32.mrb[11].mxu0  ;;  %v3573_v29 = vpop.f32.mrb[17].mxu1 }
 0x676   :  { %v654_v30 = vpop.f32.mrb[18].mxu1 }
 0x677   :  { %v3574_v31 = vpop.f32.mrb[19].mxu1 }
 0x67a   :  { %v719_v32 = vpop.f32.mrb[12].mxu0 }
 0x67b   :  { %v3581_v33 = vpop.f32.mrb[13].mxu0  ;;  %v720_v51 = vadd.f32 %v3211_v45, %v719_v32 }
 0x67c   :  { %v722_v34 = vpop.f32.mrb[14].mxu0  ;;  %v785_v35 = vpop.f32.mrb[20].mxu1 }
 0x67d   :  { %v786_v36 = vadd.f32 %v3220_v60, %v785_v35  ;;  %v3582_v38 = vpop.f32.mrb[15].mxu0  ;;  %v3589_v39 = vpop.f32.mrb[21].mxu1  ;;  %v723_v55 = vadd.f32 %v3211_v45, %v722_v34  ;;  %v858_v62 = vpack.c.bf16 %v720_v51, %v720_v51 }
 0x67e   :  { %v788_v40 = vpop.f32.mrb[22].mxu1 }
 0x67f   :  { %v860_v41 = vpack.c.bf16 %v786_v36, %v786_v36  ;;  %v789_v43 = vadd.f32 %v3220_v60, %v788_v40  ;;  %v3590_v44 = vpop.f32.mrb[23].mxu1  ;;  %v859_v0 = vpack.c.bf16 %v723_v55, %v723_v55  ;;  %v3855_v40 = vld [vmem:[%s4692_s6] sm:$0xff]  }
 0x680   :  { %v3244_v55 = vld [vmem:[%s4695_s9 + $0x2] ss:$0 sm:$0xff] }
 0x681   :  { %v866_v48 = vsel %vm428_vm14, %v860_v41, 0  ;;  %v861_v49 = vpack.c.bf16 %v789_v43, %v789_v43  ;;  %v3856_v43 = vld [vmem:[%s4692_s6 + $0x8] sm:$0xff]  }
 0x682   :  { %v851_v50 = vpop.f32.mrb[16].mxu0  ;;  %3600 = vmatpush3.bf16.xpose.msra.mxu1 %v866_v48 }
 0x683   :  { %v912_v14 = vsel %vm428_vm14, %v861_v49, 0  ;;  %v852_v52 = vadd.f32 %v3229_v47, %v851_v50  ;;  %v3597_v53 = vpop.f32.mrb[17].mxu0  ;;  %3611 = vmatprep.subr.bf16.mxu1 %v3978_v6 }
 0x684   :  { %v854_v54 = vpop.f32.mrb[18].mxu0  ;;  %3606 = vmatpush3.bf16.xpose.msra.mxu0 %v912_v14 }
 0x685   :  { %v982_v56 = vpack.c.bf16 %v852_v52, %v852_v52  ;;  %v855_v59 = vadd.f32 %v3229_v47, %v854_v54  ;;  %v3598_v61 = vpop.f32.mrb[19].mxu0  ;;  %3617 = vmatprep.subr.bf16.mxu0 %v3978_v6 }
 0x687   :  { %v983_v63 = vpack.c.bf16 %v855_v59, %v855_v59  ;;  %v988_v1 = vsel %vm567_vm15, %v982_v56, 0 }
 0x689   :  { %3602 = vmatmul.mubr.msk.bf16.vlgmr.msra.gmra.mrb[24].mxu1 %vm428_vm14, %v858_v62  ;;  %v1034_v2 = vsel %vm567_vm15, %v983_v63, 0 }
 0x68a   :  { %3612 = vmatpush3.bf16.msra.mxu1 %v988_v1  ;;  %3613 = vmatprep.mubr.msk.bf16.mxu1 %vm3979_vm1, %v3978_v6 }
 0x68b   :  { %3608 = vmatmul.mubr.msk.bf16.vlgmr.msra.gmra.mrb[20].mxu0 %vm428_vm14, %v859_v0  ;;  %3623 = vmatprep.subr.bf16.mxu1 %v3978_v6 }
 0x68c   :  { %3618 = vmatpush3.bf16.msra.mxu0 %v1034_v2  ;;  %3619 = vmatprep.mubr.msk.bf16.mxu0 %vm3979_vm1, %v3978_v6 }
 0x68d   :  { %3629 = vmatprep.subr.bf16.mxu0 %v3978_v6 }
 0x75c   :  { %v902_v3 = vpop.f32.mrb[24].mxu1 }
 0x75d   :  { %v954_v4 = vmul.f32 0.25, %v902_v3  ;;  %v3603_v5 = vpop.f32.mrb[25].mxu1 }
 0x75e   :  { %v905_v7 = vpop.f32.mrb[26].mxu1  ;;  %v948_v8 = vpop.f32.mrb[20].mxu0 }
 0x75f   :  { %v955_v9 = vmul.f32 0.25, %v948_v8  ;;  %v3604_v10 = vpop.f32.mrb[27].mxu1  ;;  %v3609_v11 = vpop.f32.mrb[21].mxu0  ;;  %v956_v12 = vadd.f32 %v954_v4, %v4196_v42 }
 0x760   :  { %v951_v13 = vpop.f32.mrb[22].mxu0 }
 0x761   :  { %v3610_v15 = vpop.f32.mrb[23].mxu0  ;;  %v958_v16 = vsel %vm537_vm0, %v956_v12, -inf  ;;  %v957_v18 = vadd.f32 %v955_v9, %v4198_v46 }
 0x762   :  { %959 = vmax.xlane.f32.xlu1 %v958_v16 }
 0x763   :  { %v961_v19 = vsel %vm537_vm0, %v957_v18, -inf }
 0x764   :  { %962 = vmax.xlane.f32.xlu0 %v961_v19 }
 0x7ef   :  { %v960_v20 = vpop.xlane.xlu1 %959 }
 0x7f0   :  { %v964_v21 = vsub.f32 %v956_v12, %v960_v20 }
 0x7f1   :  { %v963_v22 = vpop.xlane.xlu0 %962 }
 0x7f2   :  { %v966_v24 = vmul.f32 1.442695, %v964_v21  ;;  %v965_v25 = vsub.f32 %v957_v18, %v963_v22  ;;  %v3858_v18 = vld [vmem:[%s4693_s7 + $0x8] sm:$0xff]  }
 0x7f4   :  { %3901 = vpow2.f32 %v966_v24  ;;  %v968_v28 = vmul.f32 1.442695, %v965_v25 }
 0x7f6   :  { %3903 = vpow2.f32 %v968_v28 }
 0x7fe   :  { %v3902_v29 = vpop.eup %3901 }
 0x7ff   :  { %v970_v30 = vsel %vm537_vm0, %v3902_v29, 0.0 }
 0x800   :  { %v3904_v31 = vpop.eup %3903  ;;  %971 = vadd.xlane.f32.xlu1 %v970_v30 }
 0x801   :  { %v973_v32 = vsel %vm537_vm0, %v3904_v31, 0.0 }
 0x802   :  { %974 = vadd.xlane.f32.xlu0 %v973_v32 }
 0x88d   :  { %v972_v60 = vpop.xlane.xlu1 %971 }
 0x88e   :  { %3905 = vrcp.f32 %v972_v60 }
 0x88f   :  { %v975_v33 = vpop.xlane.xlu0 %974 }
 0x890   :  { %3907 = vrcp.f32 %v975_v33  ;;  %v3248_v33 = vld [vmem:[%s4695_s9 + $0x4] ss:$0 sm:$0xff] }
 0x898   :  { %v3906_v34 = vpop.eup %3905 }
 0x899   :  { %v978_v35 = vmul.f32 %v3906_v34, %v3902_v29  ;;  %v3247_v29 = vld [vmem:[%s4695_s9 + $0x3] ss:$0 sm:$0xff] }
 0x89a   :  { %v3908_v36 = vpop.eup %3907 }
 0x89b   :  { %v979_v38 = vmul.f32 %v3908_v36, %v3904_v31  ;;  %v980_v39 = vpack.c.bf16 %v978_v35, %v978_v35 }
 0x89d   :  { %3614 = vmatmul.mubr.msk.bf16.vlgmr.msra.gmra.mrb[28].mxu1 %vm537_vm0, %v980_v39  ;;  %v981_v41 = vpack.c.bf16 %v979_v38, %v979_v38  ;;  %v3859_v39 = vld [vmem:[%s4693_s7 + $0x10] sm:$0xff]  }
 0x89e   :  { %3625 = vmatprep.mubr.msk.bf16.mxu1 %vm3979_vm1, %v3978_v6  ;;  %3624 = vmatpush3.bf16.msra.mxu1 %v3856_v43 }
 0x89f   :  { %3620 = vmatmul.mubr.msk.bf16.vlgmr.msra.gmra.mrb[24].mxu0 %vm537_vm0, %v981_v41  ;;  %3635 = vmatprep.subr.bf16.mxu1 %v3978_v6  ;;  %v3860_v41 = vld [vmem:[%s4693_s7 + $0x18] sm:$0xff]  }
 0x8a0   :  { %3630 = vmatpush3.bf16.msra.mxu0 %v3855_v40  ;;  %3631 = vmatprep.mubr.msk.bf16.mxu0 %vm3979_vm1, %v3978_v6  ;;  %v1353_v40 = vsel %vm1348_vm2, %v3859_v39, 0  ;;  %v1356_v43 = vsel %vm1348_vm2, %v3860_v41, 0 }
 0x8a1   :  { %3667 = vmatprep.subr.bf16.mxu0 %v3978_v6 }
 0x8a7   :  { %3632 = vmatmul.mubr.msk.bf16.vlgmr.msra.gmra.mrb[28].mxu0 %vm428_vm14, %v657_v27 }
 0x8a8   :  { %3671 = vmatprep.mubr.msk.bf16.mxu0 %vm3979_vm1, %v3978_v6 }
 0x970   :  { %v1024_v44 = vpop.f32.mrb[28].mxu1 }
 0x971   :  { %v3615_v45 = vpop.f32.mrb[29].mxu1 }
 0x972   :  { %v1027_v47 = vpop.f32.mrb[30].mxu1  ;;  %v1070_v48 = vpop.f32.mrb[24].mxu0 }
 0x973   :  { %v1076_v49 = vpack.c.bf16 %v1070_v48, %v1024_v44  ;;  %v3616_v50 = vpop.f32.mrb[31].mxu1  ;;  %v3621_v51 = vpop.f32.mrb[25].mxu0  ;;  %v3249_v44 = vld [vmem:[%s4694_s8] ss:$0 sm:$0xff] }
 0x974   :  { %v1073_v23 = vpop.f32.mrb[26].mxu0 }
 0x975   :  { %v3622_v26 = vpop.f32.mrb[27].mxu0  ;;  %3626 = vmatmul.mubr.msk.bf16.vlgmr.msra.gmra.mrb[32].mxu1 %vm428_vm14, %v1076_v49 }
 0x976   :  { %3639 = vmatprep.mubr.msk.bf16.mxu1 %vm3979_vm1, %v3978_v6 }
 0x97a   :  { %v1173_v27 = vpop.f32.mrb[28].mxu0 }
 0x97b   :  { %v3633_v14 = vpop.f32.mrb[29].mxu0 }
 0x97c   :  { %v1176_v52 = vpop.f32.mrb[30].mxu0 }
 0x97d   :  { %v3634_v53 = vpop.f32.mrb[31].mxu0 }
 0xa48   :  { %v1123_v54 = vpop.f32.mrb[32].mxu1 }
 0xa49   :  { %v1174_v56 = vadd.f32 %v1173_v27, %v1123_v54  ;;  %v3627_v59 = vpop.f32.mrb[33].mxu1 }
 0xa4a   :  { %v1126_v61 = vpop.f32.mrb[34].mxu1 }
 0xa4b   :  { %v1188_v62 = vadd.f32 %v3244_v55, %v1174_v56  ;;  %v1177_v63 = vadd.f32 %v1176_v52, %v1126_v61  ;;  %v3628_v0 = vpop.f32.mrb[35].mxu1 }
 0xa4d   :  { %v1189_v1 = vadd.f32 %v3244_v55, %v1177_v63  ;;  %v1190_v2 = vadd.f32 %v1188_v62, %v4127_v57 }
 0xa4f   :  { %v1196_v3 = vsel %vm174_vm13, %v1190_v2, 0.0  ;;  %v1191_v4 = vadd.f32 %v1189_v1, %v4129_v58  ;;  %v3857_v58 = vld [vmem:[%s4693_s7] sm:$0xff]  }
 0xa50   :  { %1197 = vadd.xlane.f32.xlu1 %v1196_v3  ;;  %3636 = vmatpush3.bf16.msra.mxu1 %v3857_v58 }
 0xa51   :  { %v1199_v5 = vsel %vm174_vm13, %v1191_v4, 0.0  ;;  %3637 = vmatprep.subr.bf16.mxu1 %v3978_v6 }
 0xa52   :  { %1200 = vadd.xlane.f32.xlu0 %v1199_v5 }
 0xa54   :  { %3638 = vmatpush3.bf16.msra.mxu1 %v3858_v18 }
 0xa55   :  { %3643 = vmatprep.subr.bf16.mxu1 %v3978_v6 }
 0xadd   :  { %v1198_v7 = vpop.xlane.xlu1 %1197 }
 0xade   :  { %v1202_v8 = vmul.f32 0.03125, %v1198_v7  ;;  %v3258_v7 = vld [vmem:[%s4695_s9 + $0x5] ss:$0 sm:$0xff] }
 0xadf   :  { %v1201_v9 = vpop.xlane.xlu0 %1200 }
 0xae0   :  { %v1204_v10 = vsub.f32 %v1190_v2, %v1202_v8  ;;  %v1203_v11 = vmul.f32 0.03125, %v1201_v9 }
 0xae2   :  { %v1205_v12 = vsub.f32 %v1191_v4, %v1203_v11  ;;  %v1206_v13 = vmul.f32 %v1204_v10, %v1204_v10 }
 0xae4   :  { %v1208_v15 = vsel %vm174_vm13, %v1206_v13, 0.0  ;;  %v1207_v16 = vmul.f32 %v1205_v12, %v1205_v12 }
 0xae5   :  { %1209 = vadd.xlane.f32.xlu1 %v1208_v15 }
 0xae6   :  { %v1211_v57 = vsel %vm174_vm13, %v1207_v16, 0.0 }
 0xae7   :  { %1212 = vadd.xlane.f32.xlu0 %v1211_v57 }
 0xb72   :  { %v1210_v19 = vpop.xlane.xlu1 %1209 }
 0xb73   :  { %v1214_v20 = vmul.f32 0.03125, %v1210_v19 }
 0xb74   :  { %v1213_v21 = vpop.xlane.xlu0 %1212 }
 0xb75   :  { %v1216_v22 = vadd.f32 1e-12, %v1214_v20  ;;  %v1215_v24 = vmul.f32 0.03125, %v1213_v21 }
 0xb77   :  { %3909 = vrsqrt.f32 %v1216_v22  ;;  %v1217_v25 = vadd.f32 1e-12, %v1215_v24 }
 0xb79   :  { %3911 = vrsqrt.f32 %v1217_v25 }
 0xb81   :  { %v3910_v28 = vpop.eup %3909 }
 0xb82   :  { %v1220_v30 = vmul.f32 %v3910_v28, %v1204_v10 }
 0xb83   :  { %v3912_v31 = vpop.eup %3911 }
 0xb84   :  { %v1228_v32 = vmul.f32 %v3247_v29, %v1220_v30  ;;  %v1221_v60 = vmul.f32 %v3912_v31, %v1205_v12  ;;  %v3861_v31 = vld [vmem:[%s4690_s4 + $0x60] sm:$0xff]  }
 0xb86   :  { %v1229_v34 = vmul.f32 %v3247_v29, %v1221_v60  ;;  %v1236_v35 = vadd.f32 %v3248_v33, %v1228_v32  ;;  %v3862_v32 = vld [vmem:[%s4690_s4 + $0xa0] sm:$0xff]   ;;  %v3863_v60 = vld [vmem:[%s4690_s4 + $0x68] sm:$0xff]  }
 0xb87   :  { %3668 = vmatpush3.bf16.msra.mxu0 %v3862_v32 }
 0xb88   :  { %v1237_v36 = vadd.f32 %v3248_v33, %v1229_v34  ;;  %3669 = vmatprep.subr.bf16.mxu0 %v3978_v6  ;;  %v3864_v33 = vld [vmem:[%s4690_s4 + $0xa8] sm:$0xff]  }
 0xb8a   :  { %v1238_v38 = vpack.c.bf16 %v1237_v36, %v1236_v35 }
 0xb8b   :  { %3670 = vmatpush3.bf16.msra.mxu0 %v3864_v33 }
 0xb8c   :  { %3640 = vmatmul.mubr.msk.bf16.vlgmr.msra.gmra.mrb[36].mxu1 %vm174_vm13, %v1238_v38  ;;  %3681 = vmatprep.subr.bf16.mxu0 %v3978_v6 }
 0xb8d   :  { %3647 = vmatprep.mubr.msk.bf16.mxu1 %vm3979_vm1, %v3978_v6  ;;  %3644 = vmatpush3.bf16.xpose.msra.mxu1 %v1353_v40 }
 0xb8e   :  { %3645 = vmatprep.subr.bf16.mxu1 %v3978_v6 }
 0xb95   :  { %3646 = vmatpush3.bf16.xpose.msra.mxu1 %v1356_v43  ;;  %v3264_v43 = vld [vmem:[%s4695_s9 + $0x6] ss:$0 sm:$0xff] }
 0xb96   :  { %3651 = vmatprep.subr.bf16.mxu1 %v3978_v6 }
 0xc5f   :  { %v1299_v45 = vpop.f32.mrb[36].mxu1 }
 0xc60   :  { %v1300_v47 = vadd.f32 %v3249_v44, %v1299_v45  ;;  %v3641_v48 = vpop.f32.mrb[37].mxu1 }
 0xc61   :  { %v1302_v49 = vpop.f32.mrb[38].mxu1 }
 0xc62   :  { %v1308_v50 = vmul.f32 0.044715, %v1300_v47  ;;  %v1303_v51 = vadd.f32 %v3249_v44, %v1302_v49  ;;  %v3642_v23 = vpop.f32.mrb[39].mxu1  ;;  %v1306_v0 = vmul.f32 0.5, %v1300_v47  ;;  %v3265_v49 = vld [vmem:[%s4695_s9 + $0x7] ss:$0 sm:$0xff] }
 0xc64   :  { %v1310_v26 = vmul.f32 %v1308_v50, %v1300_v47  ;;  %v1309_v27 = vmul.f32 0.044715, %v1303_v51  ;;  %v1307_v1 = vmul.f32 0.5, %v1303_v51 }
 0xc66   :  { %v1312_v14 = vmul.f32 %v1310_v26, %v1300_v47  ;;  %v1311_v52 = vmul.f32 %v1309_v27, %v1303_v51  ;;  %v3865_v26 = vld [vmem:[%s4690_s4 + $0x80] sm:$0xff]  }
 0xc68   :  { %v1314_v53 = vadd.f32 %v1312_v14, %v1300_v47  ;;  %v1313_v54 = vmul.f32 %v1311_v52, %v1303_v51  ;;  %v3866_v14 = vld [vmem:[%s4690_s4 + $0x88] sm:$0xff]  }
 0xc6a   :  { %v1316_v55 = vmul.f32 0.7978846, %v1314_v53  ;;  %v1315_v56 = vadd.f32 %v1313_v54, %v1303_v51 }
 0xc6c   :  { %3913 = vtanh.f32 %v1316_v55  ;;  %v1317_v59 = vmul.f32 0.7978846, %v1315_v56 }
 0xc6e   :  { %3915 = vtanh.f32 %v1317_v59 }
 0xc76   :  { %v3914_v61 = vpop.eup %3913 }
 0xc77   :  { %v1320_v62 = vadd.f32 1.0, %v3914_v61 }
 0xc78   :  { %v3916_v63 = vpop.eup %3915 }
 0xc79   :  { %v1321_v2 = vadd.f32 1.0, %v3916_v63  ;;  %v1322_v3 = vmul.f32 %v1320_v62, %v1306_v0  ;;  %v3280_v63 = vld [vmem:[%s4691_s5 + $0x8] ss:$0 sm:$0xff] }
 0xc7b   :  { %v1323_v4 = vmul.f32 %v1321_v2, %v1307_v1 }
 0xc7d   :  { %v1324_v5 = vpack.c.bf16 %v1323_v4, %v1322_v3  ;;  %v3289_v3 = vld [vmem:[%s4691_s5 + $0xa] ss:$0 sm:$0xff] }
 0xc7f   :  { %3648 = vmatmul.mubr.msk.bf16.vlgmr.msra.gmra.mrb[40].mxu1 %vm1348_vm2, %v1324_v5 }
 0xc80   :  { %3655 = vmatprep.mubr.msk.bf16.mxu1 %vm3979_vm1, %v3978_v6  ;;  %3652 = vmatpush3.bf16.msra.mxu1 %v3861_v31 }
 0xc81   :  { %3653 = vmatprep.subr.bf16.mxu1 %v3978_v6 }
 0xc84   :  { %3654 = vmatpush3.bf16.msra.mxu1 %v3863_v60 }
 0xc85   :  { %3659 = vmatprep.subr.bf16.mxu1 %v3978_v6 }
 0xd52   :  { %v1392_v8 = vpop.f32.mrb[40].mxu1 }
 0xd53   :  { %v1393_v9 = vadd.f32 %v3258_v7, %v1392_v8  ;;  %v3649_v10 = vpop.f32.mrb[41].mxu1 }
 0xd54   :  { %v1395_v11 = vpop.f32.mrb[42].mxu1 }
 0xd55   :  { %v1396_v12 = vadd.f32 %v3258_v7, %v1395_v11  ;;  %v3650_v13 = vpop.f32.mrb[43].mxu1  ;;  %v1399_v15 = vadd.f32 %v1393_v9, %v1236_v35  ;;  %v3271_v9 = vld [vmem:[%s4691_s5 + $0x6] ss:$0 sm:$0xff] }
 0xd57   :  { %v1405_v16 = vsel %vm174_vm13, %v1399_v15, 0.0  ;;  %v1400_v57 = vadd.f32 %v1396_v12, %v1237_v36 }
 0xd58   :  { %1406 = vadd.xlane.f32.xlu1 %v1405_v16 }
 0xd59   :  { %v1408_v58 = vsel %vm174_vm13, %v1400_v57, 0.0 }
 0xd5a   :  { %1409 = vadd.xlane.f32.xlu0 %v1408_v58 }
 0xde5   :  { %v1407_v18 = vpop.xlane.xlu1 %1406 }
 0xde6   :  { %v1411_v19 = vmul.f32 0.03125, %v1407_v18 }
 0xde7   :  { %v1410_v20 = vpop.xlane.xlu0 %1409 }
 0xde8   :  { %v1413_v21 = vsub.f32 %v1399_v15, %v1411_v19  ;;  %v1412_v22 = vmul.f32 0.03125, %v1410_v20 }
 0xdea   :  { %v1414_v24 = vsub.f32 %v1400_v57, %v1412_v22  ;;  %v1415_v25 = vmul.f32 %v1413_v21, %v1413_v21 }
 0xdec   :  { %v1417_v28 = vsel %vm174_vm13, %v1415_v25, 0.0  ;;  %v1416_v29 = vmul.f32 %v1414_v24, %v1414_v24 }
 0xded   :  { %1418 = vadd.xlane.f32.xlu1 %v1417_v28 }
 0xdee   :  { %v1420_v30 = vsel %vm174_vm13, %v1416_v29, 0.0 }
 0xdef   :  { %1421 = vadd.xlane.f32.xlu0 %v1420_v30 }
 0xe7a   :  { %v1419_v34 = vpop.xlane.xlu1 %1418 }
 0xe7b   :  { %v1423_v35 = vmul.f32 0.03125, %v1419_v34 }
 0xe7c   :  { %v1422_v36 = vpop.xlane.xlu0 %1421 }
 0xe7d   :  { %v1425_v38 = vadd.f32 1e-12, %v1423_v35  ;;  %v1424_v39 = vmul.f32 0.03125, %v1422_v36 }
 0xe7f   :  { %3917 = vrsqrt.f32 %v1425_v38  ;;  %v1426_v40 = vadd.f32 1e-12, %v1424_v39 }
 0xe81   :  { %3919 = vrsqrt.f32 %v1426_v40 }
 0xe89   :  { %v3918_v41 = vpop.eup %3917 }
 0xe8a   :  { %v1429_v44 = vmul.f32 %v3918_v41, %v1413_v21 }
 0xe8b   :  { %v3920_v45 = vpop.eup %3919 }
 0xe8c   :  { %v1437_v47 = vmul.f32 %v3264_v43, %v1429_v44  ;;  %v1430_v48 = vmul.f32 %v3920_v45, %v1414_v24 }
 0xe8e   :  { %v1438_v50 = vmul.f32 %v3264_v43, %v1430_v48  ;;  %v4377_v51 = vadd.f32 %v3265_v49, %v1437_v47 }
 0xe90   :  { %v4379_v23 = vadd.f32 %v3265_v49, %v1438_v50 }
 0xe92   :  { %v4386_v27 = vpack.c.bf16 %v4379_v23, %v4377_v51 }
 0xe94   :  { %3656 = vmatmul.mubr.msk.bf16.vlgmr.msra.gmra.mrb[44].mxu1 %vm174_vm13, %v4386_v27  ;;  %3672 = vmatmul.mubr.msk.bf16.vlgmr.msra.gmra.mrb[32].mxu0 %vm174_vm13, %v4386_v27 }
 0xe95   :  { %3660 = vmatpush3.bf16.msra.mxu1 %v3865_v26  ;;  %3663 = vmatprep.mubr.msk.bf16.mxu1 %vm3979_vm1, %v3978_v6 }
 0xe96   :  { %3661 = vmatprep.subr.bf16.mxu1 %v3978_v6  ;;  %3683 = vmatprep.mubr.msk.bf16.mxu0 %vm3979_vm1, %v3978_v6 }
 0xe99   :  { %3662 = vmatpush3.bf16.msra.mxu1 %v3866_v14 }
 0xe9a   :  { %3675 = vmatprep.subr.bf16.mxu1 %v3978_v6 }
 0xe9c   :  { %3664 = vmatmul.mubr.msk.bf16.vlgmr.msra.gmra.mrb[48].mxu1 %vm174_vm13, %v4386_v27 }
 0xe9d   :  { %3677 = vmatprep.mubr.msk.bf16.mxu1 %vm3979_vm1, %v3978_v6 }
 0xf67   :  { %v1510_v52 = vpop.f32.mrb[44].mxu1  ;;  %v1642_v53 = vpop.f32.mrb[32].mxu0 }
 0xf68   :  { %v3657_v54 = vpop.f32.mrb[45].mxu1  ;;  %v3673_v55 = vpop.f32.mrb[33].mxu0  ;;  %v1643_v10 = vadd.f32 %v3289_v3, %v1642_v53  ;;  %v1511_v13 = vadd.f32 %v3271_v9, %v1510_v52 }
 0xf69   :  { %v1513_v56 = vpop.f32.mrb[46].mxu1  ;;  %v1645_v59 = vpop.f32.mrb[34].mxu0 }
 0xf6a   :  { %v3658_v61 = vpop.f32.mrb[47].mxu1  ;;  %v3674_v62 = vpop.f32.mrb[35].mxu0  ;;  %v1646_v15 = vadd.f32 %v3289_v3, %v1645_v59  ;;  %v1773_v57 = vpack.c.bf16 %v1643_v10, %v1643_v10  ;;  %v1514_v58 = vadd.f32 %v3271_v9, %v1513_v56  ;;  %v1649_v18 = vpack.c.bf16 %v1511_v13, %v1511_v13  ;;  %v3867_v56 = vld [vmem:[%s4690_s4 + $0x70] sm:$0xff]   ;;  %v3872_v3 = vld [vmem:[%s4690_s4 + $0xb8] sm:$0xff]  }
 0xf6b   :  { %v3868_v62 = vld [vmem:[%s4690_s4 + $0x90] sm:$0xff]  }
 0xf6c   :  { %v1774_v19 = vpack.c.bf16 %v1646_v15, %v1646_v15  ;;  %v1779_v20 = vsel %vm567_vm15, %v1773_v57, 0  ;;  %v1650_v21 = vpack.c.bf16 %v1514_v58, %v1514_v58 }
 0xf6e   :  { %v1825_v22 = vsel %vm567_vm15, %v1774_v19, 0 }
 0xf6f   :  { %v1576_v0 = vpop.f32.mrb[48].mxu1 }
 0xf70   :  { %v1577_v1 = vadd.f32 %v3280_v63, %v1576_v0  ;;  %v3665_v2 = vpop.f32.mrb[49].mxu1  ;;  %v3869_v0 = vld [vmem:[%s4690_s4 + $0x78] sm:$0xff]  }
 0xf71   :  { %v1579_v4 = vpop.f32.mrb[50].mxu1  ;;  %v3871_v2 = vld [vmem:[%s4690_s4 + $0xb0] sm:$0xff]  }
 0xf72   :  { %v1651_v5 = vpack.c.bf16 %v1577_v1, %v1577_v1  ;;  %v1580_v7 = vadd.f32 %v3280_v63, %v1579_v4  ;;  %v3666_v8 = vpop.f32.mrb[51].mxu1  ;;  %v3870_v1 = vld [vmem:[%s4690_s4 + $0x98] sm:$0xff]  }
 0xf74   :  { %v1657_v11 = vsel %vm428_vm14, %v1651_v5, 0  ;;  %v1652_v12 = vpack.c.bf16 %v1580_v7, %v1580_v7 }
 0xf75   :  { %3676 = vmatpush3.bf16.xpose.msra.mxu1 %v1657_v11 }
 0xf76   :  { %v1703_v16 = vsel %vm428_vm14, %v1652_v12, 0  ;;  %3687 = vmatprep.subr.bf16.mxu1 %v3978_v6 }
 0xf77   :  { %3682 = vmatpush3.bf16.xpose.msra.mxu0 %v1703_v16 }
 0xf78   :  { %3693 = vmatprep.subr.bf16.mxu0 %v3978_v6 }
 0xf7c   :  { %3678 = vmatmul.mubr.msk.bf16.vlgmr.msra.gmra.mrb[52].mxu1 %vm428_vm14, %v1649_v18 }
 0xf7d   :  { %3688 = vmatpush3.bf16.msra.mxu1 %v1779_v20  ;;  %3689 = vmatprep.mubr.msk.bf16.mxu1 %vm3979_vm1, %v3978_v6 }
 0xf7e   :  { %3684 = vmatmul.mubr.msk.bf16.vlgmr.msra.gmra.mrb[36].mxu0 %vm428_vm14, %v1650_v21  ;;  %3699 = vmatprep.subr.bf16.mxu1 %v3978_v6 }
 0xf7f   :  { %3694 = vmatpush3.bf16.msra.mxu0 %v1825_v22  ;;  %3695 = vmatprep.mubr.msk.bf16.mxu0 %vm3979_vm1, %v3978_v6 }
 0xf80   :  { %3707 = vmatprep.subr.bf16.mxu0 %v3978_v6 }
0x104f   :  { %v1693_v24 = vpop.f32.mrb[52].mxu1 }
0x1050   :  { %v1745_v25 = vmul.f32 0.25, %v1693_v24  ;;  %v3679_v28 = vpop.f32.mrb[53].mxu1 }
0x1051   :  { %v1696_v29 = vpop.f32.mrb[54].mxu1  ;;  %v1739_v30 = vpop.f32.mrb[36].mxu0  ;;  %v3304_v28 = vld [vmem:[%s4691_s5 + $0x7] ss:$0 sm:$0xff] }
0x1052   :  { %v1746_v31 = vmul.f32 0.25, %v1739_v30  ;;  %v3680_v32 = vpop.f32.mrb[55].mxu1  ;;  %v3685_v60 = vpop.f32.mrb[37].mxu0  ;;  %v1747_v33 = vadd.f32 %v1745_v25, %v4196_v42  ;;  %v3322_v29 = vld [vmem:[%s4691_s5 + $0xb] ss:$0 sm:$0xff] }
0x1053   :  { %v1742_v34 = vpop.f32.mrb[38].mxu0 }
0x1054   :  { %v3686_v35 = vpop.f32.mrb[39].mxu0  ;;  %v1749_v36 = vsel %vm537_vm0, %v1747_v33, -inf  ;;  %v1748_v38 = vadd.f32 %v1746_v31, %v4198_v46 }
0x1055   :  { %1750 = vmax.xlane.f32.xlu0 %v1749_v36 }
0x1056   :  { %v1752_v39 = vsel %vm537_vm0, %v1748_v38, -inf }
0x1057   :  { %1753 = vmax.xlane.f32.xlu1 %v1752_v39 }
0x10e2   :  { %v1751_v40 = vpop.xlane.xlu0 %1750 }
0x10e3   :  { %v1755_v41 = vsub.f32 %v1747_v33, %v1751_v40 }
0x10e4   :  { %v1754_v43 = vpop.xlane.xlu1 %1753 }
0x10e5   :  { %v1757_v44 = vmul.f32 1.442695, %v1755_v41  ;;  %v1756_v45 = vsub.f32 %v1748_v38, %v1754_v43 }
0x10e7   :  { %3921 = vpow2.f32 %v1757_v44  ;;  %v1759_v47 = vmul.f32 1.442695, %v1756_v45 }
0x10e9   :  { %3923 = vpow2.f32 %v1759_v47 }
0x10f1   :  { %v3922_v48 = vpop.eup %3921 }
0x10f2   :  { %v1761_v49 = vsel %vm537_vm0, %v3922_v48, 0.0 }
0x10f3   :  { %v3924_v50 = vpop.eup %3923  ;;  %1762 = vadd.xlane.f32.xlu0 %v1761_v49 }
0x10f4   :  { %v1764_v26 = vsel %vm537_vm0, %v3924_v50, 0.0 }
0x10f5   :  { %1765 = vadd.xlane.f32.xlu1 %v1764_v26 }
0x1180   :  { %v1763_v14 = vpop.xlane.xlu0 %1762 }
0x1181   :  { %3925 = vrcp.f32 %v1763_v14 }
0x1182   :  { %v1766_v52 = vpop.xlane.xlu1 %1765 }
0x1183   :  { %3927 = vrcp.f32 %v1766_v52 }
0x118b   :  { %v3926_v53 = vpop.eup %3925 }
0x118c   :  { %v1769_v54 = vmul.f32 %v3926_v53, %v3922_v48 }
0x118d   :  { %v3928_v55 = vpop.eup %3927 }
0x118e   :  { %v1770_v59 = vmul.f32 %v3928_v55, %v3924_v50  ;;  %v1771_v61 = vpack.c.bf16 %v1769_v54, %v1769_v54 }
0x1190   :  { %3690 = vmatmul.mubr.msk.bf16.vlgmr.msra.gmra.mrb[56].mxu1 %vm537_vm0, %v1771_v61  ;;  %v1772_v63 = vpack.c.bf16 %v1770_v59, %v1770_v59 }
0x1191   :  { %3700 = vmatpush3.bf16.msra.mxu1 %v3867_v56  ;;  %3703 = vmatprep.mubr.msk.bf16.mxu1 %vm3979_vm1, %v3978_v6 }
0x1192   :  { %3696 = vmatmul.mubr.msk.bf16.vlgmr.msra.gmra.mrb[40].mxu0 %vm537_vm0, %v1772_v63  ;;  %3701 = vmatprep.subr.bf16.mxu1 %v3978_v6 }
0x1193   :  { %3708 = vmatpush3.bf16.msra.mxu0 %v3868_v62  ;;  %3711 = vmatprep.mubr.msk.bf16.mxu0 %vm3979_vm1, %v3978_v6 }
0x1194   :  { %3709 = vmatprep.subr.bf16.mxu0 %v3978_v6 }
0x1195   :  { %3702 = vmatpush3.bf16.msra.mxu1 %v3869_v0 }
0x1196   :  { %3715 = vmatprep.subr.bf16.mxu1 %v3978_v6 }
0x1197   :  { %3710 = vmatpush3.bf16.msra.mxu0 %v3870_v1 }
0x1198   :  { %3704 = vmatmul.mubr.msk.bf16.vlgmr.msra.gmra.mrb[60].mxu1 %vm174_vm13, %v4386_v27  ;;  %3723 = vmatprep.subr.bf16.mxu0 %v3978_v6 }
0x1199   :  { %3716 = vmatpush3.bf16.msra.mxu1 %v3871_v2  ;;  %3719 = vmatprep.mubr.msk.bf16.mxu1 %vm3979_vm1, %v3978_v6 }
0x119a   :  { %3712 = vmatmul.mubr.msk.bf16.vlgmr.msra.gmra.mrb[44].mxu0 %vm174_vm13, %v4386_v27  ;;  %3717 = vmatprep.subr.bf16.mxu1 %v3978_v6 }
0x119b   :  { %3725 = vmatprep.mubr.msk.bf16.mxu0 %vm3979_vm1, %v3978_v6 }
0x119d   :  { %3718 = vmatpush3.bf16.msra.mxu1 %v3872_v3 }
0x119e   :  { %3729 = vmatprep.subr.bf16.mxu1 %v3978_v6 }
0x11a0   :  { %3720 = vmatmul.mubr.msk.bf16.vlgmr.msra.gmra.mrb[64].mxu1 %vm174_vm13, %v4386_v27  ;;  %v3313_v27 = vld [vmem:[%s4691_s5 + $0x9] ss:$0 sm:$0xff] }
0x11a1   :  { %3731 = vmatprep.mubr.msk.bf16.mxu1 %vm3979_vm1, %v3978_v6 }
0x1263   :  { %v4476_v4 = vpop.f32.mrb[56].mxu1 }
0x1264   :  { %v3691_v5 = vpop.f32.mrb[57].mxu1 }
0x1265   :  { %v1818_v7 = vpop.f32.mrb[58].mxu1  ;;  %v4478_v8 = vpop.f32.mrb[40].mxu0 }
0x1266   :  { %v1867_v9 = vpack.c.bf16 %v4478_v8, %v4476_v4  ;;  %v3692_v10 = vpop.f32.mrb[59].mxu1  ;;  %v3697_v11 = vpop.f32.mrb[41].mxu0 }
0x1267   :  { %v1864_v12 = vpop.f32.mrb[42].mxu0 }
0x1268   :  { %v3698_v13 = vpop.f32.mrb[43].mxu0 }
0x126b   :  { %v1930_v15 = vpop.f32.mrb[60].mxu1 }
0x126c   :  { %v3705_v16 = vpop.f32.mrb[61].mxu1  ;;  %v1931_v60 = vadd.f32 %v3304_v28, %v1930_v15 }
0x126d   :  { %v1933_v57 = vpop.f32.mrb[62].mxu1  ;;  %v1996_v58 = vpop.f32.mrb[44].mxu0 }
0x126e   :  { %v1997_v18 = vadd.f32 %v3313_v27, %v1996_v58  ;;  %v3706_v19 = vpop.f32.mrb[63].mxu1  ;;  %v3713_v20 = vpop.f32.mrb[45].mxu0  ;;  %v1934_v38 = vadd.f32 %v3304_v28, %v1933_v57  ;;  %v2069_v43 = vpack.c.bf16 %v1931_v60, %v1931_v60 }
0x126f   :  { %v1999_v21 = vpop.f32.mrb[46].mxu0  ;;  %v3873_v19 = vld [vmem:[%s4692_s6 + $0x10] sm:$0xff]  }
0x1270   :  { %v2071_v22 = vpack.c.bf16 %v1997_v18, %v1997_v18  ;;  %v2000_v24 = vadd.f32 %v3313_v27, %v1999_v21  ;;  %v3714_v25 = vpop.f32.mrb[47].mxu0  ;;  %v2070_v45 = vpack.c.bf16 %v1934_v38, %v1934_v38  ;;  %v3874_v21 = vld [vmem:[%s4692_s6 + $0x18] sm:$0xff]  }
0x1272   :  { %v2077_v30 = vsel %vm428_vm14, %v2071_v22, 0  ;;  %v2072_v31 = vpack.c.bf16 %v2000_v24, %v2000_v24 }
0x1273   :  { %v2062_v32 = vpop.f32.mrb[64].mxu1  ;;  %3724 = vmatpush3.bf16.xpose.msra.mxu0 %v2077_v30 }
0x1274   :  { %v2123_v33 = vsel %vm428_vm14, %v2072_v31, 0  ;;  %v2063_v34 = vadd.f32 %v3322_v29, %v2062_v32  ;;  %v3721_v35 = vpop.f32.mrb[65].mxu1  ;;  %3735 = vmatprep.subr.bf16.mxu0 %v3978_v6 }
0x1275   :  { %v2065_v36 = vpop.f32.mrb[66].mxu1  ;;  %3730 = vmatpush3.bf16.xpose.msra.mxu1 %v2123_v33  ;;  %v3337_v35 = vld [vmem:[%s4695_s9 + $0x8] ss:$0 sm:$0xff] }
0x1276   :  { %v2193_v39 = vpack.c.bf16 %v2063_v34, %v2063_v34  ;;  %v2066_v40 = vadd.f32 %v3322_v29, %v2065_v36  ;;  %v3722_v41 = vpop.f32.mrb[67].mxu1  ;;  %3741 = vmatprep.subr.bf16.mxu1 %v3978_v6 }
0x1278   :  { %v2194_v44 = vpack.c.bf16 %v2066_v40, %v2066_v40  ;;  %v2199_v47 = vsel %vm567_vm15, %v2193_v39, 0 }
0x127a   :  { %3726 = vmatmul.mubr.msk.bf16.vlgmr.msra.gmra.mrb[48].mxu0 %vm428_vm14, %v2069_v43  ;;  %v2245_v48 = vsel %vm567_vm15, %v2194_v44, 0 }
0x127b   :  { %3736 = vmatpush3.bf16.msra.mxu0 %v2199_v47  ;;  %3737 = vmatprep.mubr.msk.bf16.mxu0 %vm3979_vm1, %v3978_v6 }
0x127c   :  { %3732 = vmatmul.mubr.msk.bf16.vlgmr.msra.gmra.mrb[68].mxu1 %vm428_vm14, %v2070_v45  ;;  %3747 = vmatprep.subr.bf16.mxu0 %v3978_v6 }
0x127d   :  { %3742 = vmatpush3.bf16.msra.mxu1 %v2245_v48  ;;  %3743 = vmatprep.mubr.msk.bf16.mxu1 %vm3979_vm1, %v3978_v6 }
0x127e   :  { %3753 = vmatprep.subr.bf16.mxu1 %v3978_v6 }
0x134d   :  { %v2113_v49 = vpop.f32.mrb[48].mxu0 }
0x134e   :  { %v2165_v50 = vmul.f32 0.25, %v2113_v49  ;;  %v3727_v26 = vpop.f32.mrb[49].mxu0 }
0x134f   :  { %v2116_v14 = vpop.f32.mrb[50].mxu0  ;;  %v2159_v52 = vpop.f32.mrb[68].mxu1 }
0x1350   :  { %v2166_v53 = vmul.f32 0.25, %v2159_v52  ;;  %v3728_v54 = vpop.f32.mrb[51].mxu0  ;;  %v3733_v55 = vpop.f32.mrb[69].mxu1  ;;  %v2167_v56 = vadd.f32 %v2165_v50, %v4196_v42 }
0x1351   :  { %v2162_v59 = vpop.f32.mrb[70].mxu1 }
0x1352   :  { %v3734_v61 = vpop.f32.mrb[71].mxu1  ;;  %v2169_v62 = vsel %vm537_vm0, %v2167_v56, -inf  ;;  %v2168_v63 = vadd.f32 %v2166_v53, %v4198_v46 }
0x1353   :  { %2170 = vmax.xlane.f32.xlu1 %v2169_v62  ;;  %v3876_v61 = vld [vmem:[%s4693_s7 + $0x28] sm:$0xff]  }
0x1354   :  { %v2172_v0 = vsel %vm537_vm0, %v2168_v63, -inf }
0x1355   :  { %2173 = vmax.xlane.f32.xlu0 %v2172_v0 }
0x13e0   :  { %v2171_v1 = vpop.xlane.xlu1 %2170 }
0x13e1   :  { %v2175_v2 = vsub.f32 %v2167_v56, %v2171_v1 }
0x13e2   :  { %v2174_v3 = vpop.xlane.xlu0 %2173 }
0x13e3   :  { %v2177_v5 = vmul.f32 1.442695, %v2175_v2  ;;  %v2176_v7 = vsub.f32 %v2168_v63, %v2174_v3 }
0x13e5   :  { %3929 = vpow2.f32 %v2177_v5  ;;  %v2179_v10 = vmul.f32 1.442695, %v2176_v7  ;;  %v3340_v7 = vld [vmem:[%s4695_s9 + $0x9] ss:$0 sm:$0xff] }
0x13e7   :  { %3931 = vpow2.f32 %v2179_v10 }
0x13ef   :  { %v3930_v11 = vpop.eup %3929 }
0x13f0   :  { %v2181_v42 = vsel %vm537_vm0, %v3930_v11, 0.0 }
0x13f1   :  { %v3932_v12 = vpop.eup %3931  ;;  %2182 = vadd.xlane.f32.xlu1 %v2181_v42 }
0x13f2   :  { %v2184_v13 = vsel %vm537_vm0, %v3932_v12, 0.0 }
0x13f3   :  { %2185 = vadd.xlane.f32.xlu0 %v2184_v13  ;;  %v3341_v13 = vld [vmem:[%s4695_s9 + $0xa] ss:$0 sm:$0xff] }
0x147e   :  { %v2183_v46 = vpop.xlane.xlu1 %2182 }
0x147f   :  { %3933 = vrcp.f32 %v2183_v46 }
0x1480   :  { %v2186_v15 = vpop.xlane.xlu0 %2185 }
0x1481   :  { %3935 = vrcp.f32 %v2186_v15 }
0x1489   :  { %v3934_v27 = vpop.eup %3933 }
0x148a   :  { %v2189_v16 = vmul.f32 %v3934_v27, %v3930_v11 }
0x148b   :  { %v3936_v57 = vpop.eup %3935 }
0x148c   :  { %v2190_v58 = vmul.f32 %v3936_v57, %v3932_v12  ;;  %v2191_v18 = vpack.c.bf16 %v2189_v16, %v2189_v16  ;;  %v3877_v57 = vld [vmem:[%s4693_s7 + $0x30] sm:$0xff]  }
0x148e   :  { %3738 = vmatmul.mubr.msk.bf16.vlgmr.msra.gmra.mrb[52].mxu0 %vm537_vm0, %v2191_v18  ;;  %v2192_v20 = vpack.c.bf16 %v2190_v58, %v2190_v58  ;;  %v2565_v58 = vsel %vm1348_vm2, %v3877_v57, 0  ;;  %v3878_v18 = vld [vmem:[%s4693_s7 + $0x38] sm:$0xff]  }
0x148f   :  { %3749 = vmatprep.mubr.msk.bf16.mxu0 %vm3979_vm1, %v3978_v6  ;;  %3748 = vmatpush3.bf16.msra.mxu0 %v3874_v21 }
0x1490   :  { %3744 = vmatmul.mubr.msk.bf16.vlgmr.msra.gmra.mrb[72].mxu1 %vm537_vm0, %v2192_v20  ;;  %3759 = vmatprep.subr.bf16.mxu0 %v3978_v6  ;;  %v3347_v20 = vld [vmem:[%s4694_s8 + $0x1] ss:$0 sm:$0xff] }
0x1491   :  { %3754 = vmatpush3.bf16.msra.mxu1 %v3873_v19  ;;  %3755 = vmatprep.mubr.msk.bf16.mxu1 %vm3979_vm1, %v3978_v6  ;;  %v2568_v19 = vsel %vm1348_vm2, %v3878_v18, 0 }
0x1492   :  { %3767 = vmatprep.subr.bf16.mxu1 %v3978_v6 }
0x1498   :  { %3756 = vmatmul.mubr.msk.bf16.vlgmr.msra.gmra.mrb[76].mxu1 %vm428_vm14, %v1867_v9 }
0x1499   :  { %3771 = vmatprep.mubr.msk.bf16.mxu1 %vm3979_vm1, %v3978_v6 }
0x149a   :  { %3768 = vmatpush3.bf16.xpose.msra.mxu1 %v2565_v58 }
0x149b   :  { %3769 = vmatprep.subr.bf16.mxu1 %v3978_v6 }
0x14a2   :  { %3770 = vmatpush3.bf16.xpose.msra.mxu1 %v2568_v19 }
0x14a3   :  { %3790 = vmatprep.subr.bf16.mxu1 %v3978_v6 }
0x1561   :  { %v2235_v22 = vpop.f32.mrb[52].mxu0 }
0x1562   :  { %v3739_v24 = vpop.f32.mrb[53].mxu0 }
0x1563   :  { %v2238_v25 = vpop.f32.mrb[54].mxu0  ;;  %v2281_v28 = vpop.f32.mrb[72].mxu1 }
0x1564   :  { %v2287_v29 = vpack.c.bf16 %v2281_v28, %v2235_v22  ;;  %v3740_v30 = vpop.f32.mrb[55].mxu0  ;;  %v3745_v31 = vpop.f32.mrb[73].mxu1 }
0x1565   :  { %v2284_v4 = vpop.f32.mrb[74].mxu1 }
0x1566   :  { %v3746_v8 = vpop.f32.mrb[75].mxu1  ;;  %3750 = vmatmul.mubr.msk.bf16.vlgmr.msra.gmra.mrb[56].mxu0 %vm428_vm14, %v2287_v29 }
0x1567   :  { %3763 = vmatprep.mubr.msk.bf16.mxu0 %vm3979_vm1, %v3978_v6 }
0x156b   :  { %v2384_v9 = vpop.f32.mrb[76].mxu1 }
0x156c   :  { %v3757_v32 = vpop.f32.mrb[77].mxu1 }
0x156d   :  { %v2387_v60 = vpop.f32.mrb[78].mxu1 }
0x156e   :  { %v3758_v33 = vpop.f32.mrb[79].mxu1 }
0x1639   :  { %v2334_v34 = vpop.f32.mrb[56].mxu0 }
0x163a   :  { %v2385_v36 = vadd.f32 %v2384_v9, %v2334_v34  ;;  %v3751_v38 = vpop.f32.mrb[57].mxu0 }
0x163b   :  { %v2337_v39 = vpop.f32.mrb[58].mxu0 }
0x163c   :  { %v2399_v40 = vadd.f32 %v3337_v35, %v2385_v36  ;;  %v2388_v41 = vadd.f32 %v2387_v60, %v2337_v39  ;;  %v3752_v43 = vpop.f32.mrb[59].mxu0 }
0x163e   :  { %v2400_v44 = vadd.f32 %v3337_v35, %v2388_v41  ;;  %v2401_v45 = vadd.f32 %v2399_v40, %v4377_v51 }
0x1640   :  { %v2407_v47 = vsel %vm174_vm13, %v2401_v45, 0.0  ;;  %v2402_v48 = vadd.f32 %v2400_v44, %v4379_v23  ;;  %v3875_v23 = vld [vmem:[%s4693_s7 + $0x20] sm:$0xff]  }
0x1641   :  { %2408 = vadd.xlane.f32.xlu1 %v2407_v47  ;;  %3760 = vmatpush3.bf16.msra.mxu0 %v3875_v23 }
0x1642   :  { %v2410_v49 = vsel %vm174_vm13, %v2402_v48, 0.0  ;;  %3761 = vmatprep.subr.bf16.mxu0 %v3978_v6 }
0x1643   :  { %2411 = vadd.xlane.f32.xlu0 %v2410_v49 }
0x1645   :  { %3762 = vmatpush3.bf16.msra.mxu0 %v3876_v61 }
0x16ce   :  { %v2409_v50 = vpop.xlane.xlu1 %2408 }
0x16cf   :  { %v2413_v26 = vmul.f32 0.03125, %v2409_v50 }
0x16d0   :  { %v2412_v14 = vpop.xlane.xlu0 %2411 }
0x16d1   :  { %v2415_v52 = vsub.f32 %v2401_v45, %v2413_v26  ;;  %v2414_v53 = vmul.f32 0.03125, %v2412_v14 }
0x16d3   :  { %v2416_v54 = vsub.f32 %v2402_v48, %v2414_v53  ;;  %v2417_v55 = vmul.f32 %v2415_v52, %v2415_v52  ;;  %v3356_v48 = vld [vmem:[%s4695_s9 + $0xb] ss:$0 sm:$0xff] }
0x16d5   :  { %v2419_v56 = vsel %vm174_vm13, %v2417_v55, 0.0  ;;  %v2418_v59 = vmul.f32 %v2416_v54, %v2416_v54 }
0x16d6   :  { %2420 = vadd.xlane.f32.xlu1 %v2419_v56 }
0x16d7   :  { %v2422_v51 = vsel %vm174_vm13, %v2418_v59, 0.0 }
0x16d8   :  { %2423 = vadd.xlane.f32.xlu0 %v2422_v51 }
0x1763   :  { %v2421_v62 = vpop.xlane.xlu1 %2420 }
0x1764   :  { %v2425_v63 = vmul.f32 0.03125, %v2421_v62 }
0x1765   :  { %v2424_v0 = vpop.xlane.xlu0 %2423 }
0x1766   :  { %v2427_v1 = vadd.f32 1e-12, %v2425_v63  ;;  %v2426_v2 = vmul.f32 0.03125, %v2424_v0 }
0x1768   :  { %3937 = vrsqrt.f32 %v2427_v1  ;;  %v2428_v3 = vadd.f32 1e-12, %v2426_v2 }
0x176a   :  { %3939 = vrsqrt.f32 %v2428_v3 }
0x1772   :  { %v3938_v5 = vpop.eup %3937 }
0x1773   :  { %v2431_v10 = vmul.f32 %v3938_v5, %v2415_v52 }
0x1774   :  { %v3940_v11 = vpop.eup %3939 }
0x1775   :  { %v2439_v42 = vmul.f32 %v3340_v7, %v2431_v10  ;;  %v2432_v12 = vmul.f32 %v3940_v11, %v2416_v54  ;;  %v3980_v10 = vmov 0.0|0.0  }
0x1776   :  { %3825 = vmatprep.subr.bf16.mxu0 %v3980_v10 }
0x1777   :  { %v2440_v46 = vmul.f32 %v3340_v7, %v2432_v12  ;;  %v2447_v15 = vadd.f32 %v3341_v13, %v2439_v42  ;;  %v2878_v7 = vld [vmem:[%s4688_s2] sm:$0x3f] }
0x1779   :  { %v2448_v27 = vadd.f32 %v3341_v13, %v2440_v46 }
0x177b   :  { %v2449_v16 = vpack.c.bf16 %v2448_v27, %v2447_v15 }
0x177d   :  { %3764 = vmatmul.mubr.msk.bf16.vlgmr.msra.gmra.mrb[60].mxu0 %vm174_vm13, %v2449_v16  ;;  %v3362_v16 = vld [vmem:[%s4695_s9 + $0xc] ss:$0 sm:$0xff] }
0x177e   :  { %3779 = vmatprep.mubr.msk.f32.mxu0 %vm3979_vm1, %v3978_v6 }
0x1850   :  { %v2512_v21 = vpop.f32.mrb[60].mxu0 }
0x1851   :  { %v2513_v22 = vadd.f32 %v3347_v20, %v2512_v21  ;;  %v3765_v24 = vpop.f32.mrb[61].mxu0  ;;  %v2661_v21 = vmul.u32 8, %v4193_v37  ;;  %v3880_v37 = vld [vmem:[%s4696_s10 + $0x8] sm:$0xff]  }
0x1852   :  { %v2515_v25 = vpop.f32.mrb[62].mxu0 }
0x1853   :  { %v2521_v28 = vmul.f32 0.044715, %v2513_v22  ;;  %v2516_v29 = vadd.f32 %v3347_v20, %v2515_v25  ;;  %v3766_v30 = vpop.f32.mrb[63].mxu0  ;;  %v2519_v40 = vmul.f32 0.5, %v2513_v22  ;;  %v3363_v20 = vld [vmem:[%s4695_s9 + $0xd] ss:$0 sm:$0xff]  ;;  %vm2662_vm3 = vcmp.eq.s32.totalorder %v4097_v17, %v2661_v21 }
0x1854   :  { %v3879_v30 = vld [vmem:[%s4696_s10] sm:$0xff]  }
0x1855   :  { %v2523_v31 = vmul.f32 %v2521_v28, %v2513_v22  ;;  %v2522_v4 = vmul.f32 0.044715, %v2516_v29  ;;  %v2520_v41 = vmul.f32 0.5, %v2516_v29 }
0x1857   :  { %v2525_v8 = vmul.f32 %v2523_v31, %v2513_v22  ;;  %v2524_v9 = vmul.f32 %v2522_v4, %v2516_v29 }
0x1859   :  { %v2527_v32 = vadd.f32 %v2525_v8, %v2513_v22  ;;  %v2526_v60 = vmul.f32 %v2524_v9, %v2516_v29 }
0x185b   :  { %v2529_v33 = vmul.f32 0.7978846, %v2527_v32  ;;  %v2528_v34 = vadd.f32 %v2526_v60, %v2516_v29  ;;  %v2663_v29 = vsel %vm2662_vm3, 1.0, %v3978_v6  ;;  %v3881_v60 = vld [vmem:[%s4696_s10 + $0x20] sm:$0xff]  }
0x185d   :  { %3941 = vtanh.f32 %v2529_v33  ;;  %v2530_v35 = vmul.f32 0.7978846, %v2528_v34  ;;  %v3882_v33 = vld [vmem:[%s4696_s10 + $0x28] sm:$0xff]  }
0x185f   :  { %3943 = vtanh.f32 %v2530_v35 }
0x1867   :  { %v3942_v36 = vpop.eup %3941 }
0x1868   :  { %v2533_v38 = vadd.f32 1.0, %v3942_v36 }
0x1869   :  { %v3944_v39 = vpop.eup %3943 }
0x186a   :  { %v2534_v43 = vadd.f32 1.0, %v3944_v39  ;;  %v2535_v44 = vmul.f32 %v2533_v38, %v2519_v40 }
0x186c   :  { %v2536_v45 = vmul.f32 %v2534_v43, %v2520_v41 }
0x186e   :  { %v2537_v47 = vpack.c.bf16 %v2536_v45, %v2535_v44  ;;  %v3883_v44 = vld [vmem:[%s4696_s10 + $0x10] sm:$0xff]  }
0x1870   :  { %3772 = vmatmul.mubr.msk.bf16.vlgmr.msra.gmra.mrb[80].mxu1 %vm1348_vm2, %v2537_v47  ;;  %v3884_v47 = vld [vmem:[%s4696_s10 + $0x18] sm:$0xff]  }
0x1871   :  { %3794 = vmatprep.mubr.msk.bf16.mxu1 %vm3979_vm1, %v3978_v6  ;;  %3791 = vmatpush3.bf16.msra.mxu1 %v3881_v60 }
0x1872   :  { %3792 = vmatprep.subr.bf16.mxu1 %v3978_v6 }
0x1875   :  { %3793 = vmatpush3.bf16.msra.mxu1 %v3882_v33 }
0x1876   :  { %3805 = vmatprep.subr.bf16.mxu1 %v3978_v6 }
0x1943   :  { %v2604_v49 = vpop.f32.mrb[80].mxu1 }
0x1944   :  { %v2605_v50 = vadd.f32 %v3356_v48, %v2604_v49  ;;  %v3773_v26 = vpop.f32.mrb[81].mxu1  ;;  %v3378_v49 = vld [vmem:[%s4697_s11 + $0x1] ss:$0 sm:$0xff] }
0x1945   :  { %v2607_v14 = vpop.f32.mrb[82].mxu1 }
0x1946   :  { %v2608_v52 = vadd.f32 %v3356_v48, %v2607_v14  ;;  %v3774_v53 = vpop.f32.mrb[83].mxu1  ;;  %v2611_v54 = vadd.f32 %v2605_v50, %v2447_v15 }
0x1948   :  { %v2617_v55 = vsel %vm174_vm13, %v2611_v54, 0.0  ;;  %v2612_v56 = vadd.f32 %v2608_v52, %v2448_v27 }
0x1949   :  { %2618 = vadd.xlane.f32.xlu1 %v2617_v55 }
0x194a   :  { %v2620_v59 = vsel %vm174_vm13, %v2612_v56, 0.0 }
0x194b   :  { %2621 = vadd.xlane.f32.xlu0 %v2620_v59 }
0x19d6   :  { %v2619_v51 = vpop.xlane.xlu1 %2618 }
0x19d7   :  { %v2623_v23 = vmul.f32 0.03125, %v2619_v51 }
0x19d8   :  { %v2622_v61 = vpop.xlane.xlu0 %2621 }
0x19d9   :  { %v2625_v62 = vsub.f32 %v2611_v54, %v2623_v23  ;;  %v2624_v63 = vmul.f32 0.03125, %v2622_v61  ;;  %v3385_v54 = vld [vmem:[%s4695_s9 + $0xf] ss:$0 sm:$0xff] }
0x19db   :  { %v2626_v0 = vsub.f32 %v2612_v56, %v2624_v63  ;;  %v2627_v1 = vmul.f32 %v2625_v62, %v2625_v62  ;;  %v3885_v63 = vld [vmem:[%s4689_s3] sm:$0xff]  }
0x19dd   :  { %v2629_v2 = vsel %vm174_vm13, %v2627_v1, 0.0  ;;  %v2628_v3 = vmul.f32 %v2626_v0, %v2626_v0 }
0x19de   :  { %2630 = vadd.xlane.f32.xlu1 %v2629_v2 }
0x19df   :  { %v2632_v5 = vsel %vm174_vm13, %v2628_v3, 0.0 }
0x19e0   :  { %2633 = vadd.xlane.f32.xlu0 %v2632_v5 }
0x19ef   :  { %2880 = vperm.xlu1 %3837, %v2878_v7  }
0x1a6b   :  { %v2631_v11 = vpop.xlane.xlu1 %2630 }
0x1a6c   :  { %v2635_v42 = vmul.f32 0.03125, %v2631_v11 }
0x1a6d   :  { %v2634_v12 = vpop.xlane.xlu0 %2633 }
0x1a6e   :  { %v2637_v13 = vadd.f32 1e-12, %v2635_v42  ;;  %v2636_v46 = vmul.f32 0.03125, %v2634_v12  ;;  %v3887_v42 = vld [vmem:[%s4689_s3 + $0x10] sm:$0xff]  }
0x1a6f   :  { %v2881_v9 = vpop.permute.xlu1 %2880  ;;  %v3102_v12 = vsel %vm174_vm13, %v3887_v42, 0 }
0x1a70   :  { %3945 = vrsqrt.f32 %v2637_v13  ;;  %v2638_v15 = vadd.f32 1e-12, %v2636_v46  ;;  %vm2882_vm4 = vcmp.eq.s32.totalorder %v4097_v17, %v2881_v9  ;;  %v3366_v17 = vld [vmem:[%s4695_s9 + $0xe] ss:$0 sm:$0xff] }
0x1a71   :  { %v2883_v32 = vsel %vm2882_vm4, 1.0, %v3978_v6  ;;  %v3888_v13 = vld [vmem:[%s4689_s3 + $0x18] ss:$0 sps:$4 sm:$0x11]  }
0x1a72   :  { %3947 = vrsqrt.f32 %v2638_v15  ;;  %v3105_v46 = vsel %vm174_vm13, %v3888_v13, 0 }
0x1a7a   :  { %v3946_v27 = vpop.eup %3945 }
0x1a7b   :  { %v2641_v57 = vmul.f32 %v3946_v27, %v2625_v62 }
0x1a7c   :  { %v3948_v58 = vpop.eup %3947 }
0x1a7d   :  { %v2642_v18 = vmul.f32 %v3948_v58, %v2626_v0  ;;  %v2649_v19 = vmul.f32 %v3362_v16, %v2641_v57  ;;  %v3096_v0 = vsel %vm174_vm13, %v3885_v63, 0  ;;  %v3391_v58 = vld [vmem:[%s4695_s9 + $0x10] ss:$0 sm:$0xff] }
0x1a7f   :  { %v2650_v22 = vmul.f32 %v3362_v16, %v2642_v18  ;;  %v2657_v24 = vadd.f32 %v3363_v20, %v2649_v19 }
0x1a81   :  { %v2658_v25 = vadd.f32 %v3363_v20, %v2650_v22 }
0x1a83   :  { %v3826_v28 = vpack.c.bf16 %v2658_v25, %v2657_v24 }
0x1a85   :  { %3827 = vmatpush3.bf16.msra.mxu0 %v3826_v28 }
0x1a86   :  { %3782 = vmatprep.subr.bf16.mxu0 %v3978_v6 }
0x1a88   :  { %3780 = vmatmul.mubr.msk.f32.vlgmr.msra.gmra.mrb[64].mxu0 %vm428_vm14, %v2663_v29 }
0x1a89   :  { %3783 = vmatpush3.bf16.msra.mxu0 %v3879_v30  ;;  %3786 = vmatprep.mubr.msk.bf16.mxu0 %vm3979_vm1, %v3978_v6 }
0x1a8a   :  { %3784 = vmatprep.subr.bf16.mxu0 %v3978_v6 }
0x1a8d   :  { %3785 = vmatpush3.bf16.msra.mxu0 %v3880_v37 }
0x1a8e   :  { %3828 = vmatprep.subr.bf16.mxu0 %v3980_v10  ;;  %v3886_v10 = vld [vmem:[%s4689_s3 + $0x8] sm:$0xff]   ;;  %s3981_s3 = smov [#allocation2]  }
0x1a8f   :  { %v3099_v11 = vsel %vm174_vm13, %v3886_v10, 0  ;;  %s3157_s27 = sshll.u32 %s3981_s3, 4  ;;  %s3158_s27 = int_to_ptr.vmem [resolvable:$true] %s3157_s27 }
0x1a90   :  { %s3953_s0 = scalar_lea.vmem %s3158_s27, 32  ;;  %p3958_p1 = scmp.lt.s32.totalorder %s3158_s27, %s3158_s27 }
0x1a91   :  { %p3954_p0 = scmp.ne.s32.totalorder %s3158_s27, %s3953_s0  ;;  %p3959_p2 = scmp.lt.s32.totalorder %s3953_s0, %s3953_s0 }
0x1a93   :  { %p3960_p3 = por %p3959_p2, %p3958_p1 }
0x1a95   :  { %p3961_p4 = pnand %p3960_p3, %p3954_p0 }
0x1b5b   :  { %v2733_v31 = vpop.f32.mrb[64].mxu0 }
0x1b5c   :  { %v2737_v4 = vpack.c.bf16 %v2733_v31, %v2733_v31  ;;  %v3781_v8 = vpop.f32.mrb[65].mxu0 }
0x1b5e   :  { %3787 = vmatmul.mubr.msk.bf16.vlgmr.msra.gmra.mrb[68].mxu0 %vm174_vm13, %v2737_v4 }
0x1b5f   :  { %3830 = vmatpush3.bf16.msra.mxu0 %v3826_v28  ;;  %3802 = vmatprep.mubr.msk.f32.mxu0 %vm3979_vm1, %v3978_v6 }
0x1b60   :  { %3813 = vmatprep.subr.bf16.mxu0 %v3978_v6 }
0x1b66   :  { %3803 = vmatmul.mubr.msk.f32.vlgmr.msra.gmra.mrb[66].mxu0 %vm428_vm14, %v2883_v32 }
0x1b67   :  { %3821 = vmatprep.mubr.msk.bf16.mxu0 %vm3979_vm1, %v3978_v6 }
0x1b68   :  { %3814 = vmatpush3.bf16.xpose.msra.mxu0 %v3096_v0 }
0x1b69   :  { %3815 = vmatprep.subr.bf16.mxu0 %v3978_v6 }
0x1b70   :  { %3816 = vmatpush3.bf16.xpose.msra.mxu0 %v3099_v11 }
0x1b71   :  { %3817 = vmatprep.subr.bf16.mxu0 %v3978_v6 }
0x1b78   :  { %3818 = vmatpush3.bf16.xpose.msra.mxu0 %v3102_v12 }
0x1b79   :  { %3819 = vmatprep.subr.bf16.mxu0 %v3978_v6 }
0x1b80   :  { %3820 = vmatpush3.bf16.xpose.msra.mxu0 %v3105_v46 }
0x1c31   :  { %v2799_v34 = vpop.f32.mrb[68].mxu0 }
0x1c32   :  { %v2800_v35 = vadd.f32 %v3366_v17, %v2799_v34  ;;  %v3788_v36 = vpop.f32.mrb[69].mxu0 }
0x1c33   :  { %v2802_v38 = vpop.f32.mrb[70].mxu0 }
0x1c34   :  { %3949 = vtanh.f32 %v2800_v35  ;;  %v3789_v39 = vpop.f32.mrb[71].mxu0 }
0x1c39   :  { %v2953_v40 = vpop.f32.mrb[66].mxu0 }
0x1c3a   :  { %v3804_v41 = vpop.f32.mrb[67].mxu0  ;;  %v2957_v48 = vpack.c.bf16 %v2953_v40, %v2953_v40 }
0x1c3e   :  { %v3950_v43 = vpop.eup %3949 }
0x1c3f   :  { %v2806_v45 = vpack.c.bf16 %v3950_v43, %v3950_v43 }
0x1c41   :  { %3795 = vmatmul.mubr.msk.bf16.vlgmr.msra.gmra.mrb[84].mxu1 %vm174_vm13, %v2806_v45 }
0x1c42   :  { %3806 = vmatpush3.bf16.msra.mxu1 %v3883_v44  ;;  %3809 = vmatprep.mubr.msk.bf16.mxu1 %vm3979_vm1, %v3978_v6  ;;  %vm3031_vm1 = vcmask 259072  }
0x1c43   :  { %3807 = vmatprep.subr.bf16.mxu1 %v3978_v6  ;;  %v3392_v6 = vld [vmem:[%s4695_s9 + $0x11] ss:$0 sm:$0xff] }
0x1c46   :  { %3808 = vmatpush3.bf16.msra.mxu1 %v3884_v47 }
0x1c49   :  { %3810 = vmatmul.mubr.msk.bf16.vlgmr.msra.gmra.mrb[88].mxu1 %vm174_vm13, %v2957_v48 }
0x1d14   :  { %v2861_v50 = vpop.f32.mrb[84].mxu1 }
0x1d15   :  { %v2875_v26 = vadd.f32 %v3378_v49, %v2861_v50  ;;  %v3796_v14 = vpop.f32.mrb[85].mxu1 }
0x1d16   :  { %v2864_v52 = vpop.f32.mrb[86].mxu1 }
0x1d17   :  { %v3797_v53 = vpop.f32.mrb[87].mxu1  ;;  %2877 = vst.msk [vmem:[#allocation2] sm:$0x3] %vm2876_vm5, %v2875_v26 }
0x1d1c   :  { %v3020_v55 = vpop.f32.mrb[88].mxu1 }
0x1d1d   :  { %v3021_v56 = vadd.f32 %v3385_v54, %v3020_v55  ;;  %v3811_v59 = vpop.f32.mrb[89].mxu1 }
0x1d1e   :  { %v3023_v51 = vpop.f32.mrb[90].mxu1 }
0x1d1f   :  { %v3026_v23 = vmax.f32 %v3021_v56, 0.0  ;;  %v3812_v61 = vpop.f32.mrb[91].mxu1 }
0x1d21   :  { %v3032_v62 = vsel %vm3031_vm1, %v3026_v23, 0.0 }
0x1d22   :  { %3033 = vadd.xlane.f32.xlu0 %v3032_v62 }
0x1daf   :  { %v3034_v1 = vpop.xlane.xlu0 %3033 }
0x1db0   :  { %v3035_v2 = vmul.f32 0.03125, %v3034_v1 }
0x1db2   :  { %v3036_v3 = vsub.f32 %v3026_v23, %v3035_v2 }
0x1db4   :  { %v3037_v5 = vmul.f32 %v3036_v3, %v3036_v3 }
0x1db6   :  { %v3038_v7 = vsel %vm3031_vm1, %v3037_v5, 0.0 }
0x1db7   :  { %3039 = vadd.xlane.f32.xlu0 %v3038_v7 }
0x1e44   :  { %v3040_v15 = vpop.xlane.xlu0 %3039 }
0x1e45   :  { %v3041_v27 = vmul.f32 0.03125, %v3040_v15 }
0x1e47   :  { %v3042_v16 = vadd.f32 1e-12, %v3041_v27 }
0x1e49   :  { %3951 = vrsqrt.f32 %v3042_v16 }
0x1e53   :  { %v3952_v57 = vpop.eup %3951 }
0x1e54   :  { %v3044_v18 = vmul.f32 %v3952_v57, %v3036_v3 }
0x1e56   :  { %v3051_v19 = vmul.f32 %v3391_v58, %v3044_v18 }
0x1e58   :  { %v3058_v20 = vadd.f32 %v3392_v6, %v3051_v19 }
0x1e5a   :  { %v3059_v21 = vpack.c.bf16 %v3058_v20, %v3058_v20 }
0x1e5c   :  { %3822 = vmatmul.mubr.msk.bf16.vlgmr.msra.gmra.mrb[72].mxu0 %vm174_vm13, %v3059_v21 }
0x1e5d   :  { %3964 = shalt.err (!%p3961_p4)
}
0x1e5e   :  { %s3965_s30 = scalar_lea.hbm %s4699_s13, 32 }
0x1e5f   :  { %p3966_p5 = scmp.ne.s32.totalorder %s4699_s13, %s3965_s30  ;;  %p3969_p6 = scmp.lt.u32.totalorder %s3965_s30, %s4699_s13 }
0x1e61   :  { %p3971_p7 = pnand %p3969_p6, %p3966_p5 }
0x1e63   :  { %3974 = shalt.err (!%p3971_p7)
}
0x1e64   :  { %3160 = dma.vmem_to_hbm [thread:$0]  %s3158_s27, 32, %s4699_s13, [#allocation3]   ;;  %v3393_v22 = vld [vmem:[%s4697_s11] ss:$0 sm:$0xff]  ;;  %vm3147_vm6 = vcmask 406528  }
0x1f2f   :  { %v3141_v24 = vpop.f32.mrb[72].mxu0 }
0x1f30   :  { %v3142_v25 = vadd.f32 %v3393_v22, %v3141_v24  ;;  %v3823_v28 = vpop.f32.mrb[73].mxu0 }
0x1f31   :  { %v3144_v29 = vpop.f32.mrb[74].mxu0 }
0x1f32   :  { %3148 = vst.msk [vmem:[%s4698_s12] sm:$0x3f] %vm3147_vm6, %v3142_v25  ;;  %v3824_v30 = vpop.f32.mrb[75].mxu0 }
0x1f33   :  { %3975 = dma.done.wait [#allocation3], 32  }
0x1f34   :  { %3976 = vsyncadd [#allocation3], 4294967264 }
0x1f35   :  { %3166 = vsyncpa [#allocation3], 1 }

</bundles_post_ra>
